<compile_context>
chip_gen: v7x
topology: tpu7x:2x2x1
jax: 0.10.0
libtpu: 0.0.40
codegen_flags: <defaults>
</compile_context>

<pallas_src>
import functools
import math

import jax
import jax.numpy as jnp
from jax.experimental import pallas as pl
from jax.experimental.pallas import tpu as pltpu

# ----------------------------- config (small, synthetic) -----------------------------
N_LAYER = 2
N_EMBD = 32
VOCAB = 101
BLOCK_SIZE = 16
N_CLASSES = 5

D_STATE = 16
D_CONV = 4
EXPAND = 2
D_INNER = EXPAND * N_EMBD                 # 64
DT_RANK = math.ceil(N_EMBD / 16)          # 2
LN_EPS = 1e-5


# ----------------------------- small in-kernel helpers -------------------------------
def _sigmoid(x):
    return 1.0 / (1.0 + jnp.exp(-x))


def _silu(x):
    return x * _sigmoid(x)


def _softplus(x):
    # numerically stable softplus using only exp/log/abs/max
    return jnp.maximum(x, 0.0) + jnp.log(1.0 + jnp.exp(-jnp.abs(x)))


def _erf(x):
    # Abramowitz & Stegun 7.1.26 rational approximation, |err| < 1.5e-7.
    # TODO(synk): replace with native erf lowering if/when available in Mosaic.
    a1, a2, a3, a4, a5 = 0.254829592, -0.284496736, 1.421413741, -1.453152027, 1.061405429
    p = 0.3275911
    s = jnp.where(x >= 0.0, 1.0, -1.0)
    ax = jnp.abs(x)
    t = 1.0 / (1.0 + p * ax)
    poly = ((((a5 * t + a4) * t + a3) * t + a2) * t + a1) * t
    return s * (1.0 - poly * jnp.exp(-ax * ax))


def _gelu_exact(x):
    # matches torch.nn.GELU() (erf form) up to ~1e-7
    return 0.5 * x * (1.0 + _erf(x * 0.7071067811865476))


def _layernorm_vals(x, w, b):
    mu = jnp.mean(x, axis=-1, keepdims=True)
    xc = x - mu
    var = jnp.mean(xc * xc, axis=-1, keepdims=True)
    return xc * jax.lax.rsqrt(var + LN_EPS) * w + b


# ----------------------------- single fused kernel (all layers + head) -----------------
def _fused_kernel(x_ref,
                  ln1_w_ref, ln1_b_ref,
                  w_in_ref, conv_w_ref, conv_b_ref, wx_ref, wdt_ref, dtb_ref,
                  a_t_ref, d_ref, w_out_ref,
                  ln2_w_ref, ln2_b_ref, w1_ref, b1_ref, w2_ref, b2_ref,
                  lnf_w_ref, lnf_b_ref, score_w_ref,
                  logits_ref,
                  res_scr, h_scr,
                  *, seqlen, d_conv, d_inner, d_state, dt_rank, n_layer):
    # grid = (batch, layer); one grid step == one layer of one batch element.
    layer = pl.program_id(1)

    # Residual stream stays resident in VMEM across the whole layer axis.
    @pl.when(layer == 0)
    def _():
        res_scr[...] = x_ref[...].astype(jnp.float32)

    x0 = res_scr[...]                                                # (L, D)

    # ---------------- ln_1 ----------------
    xn = _layernorm_vals(x0, ln1_w_ref[...], ln1_b_ref[...])

    # ---------------- Mamba ----------------
    # in_proj (bias=False); split with static lane slices.
    xz = jnp.dot(xn, w_in_ref[...], preferred_element_type=jnp.float32)   # (L, 2*d_inner)
    xs = xz[:, :d_inner]                                                  # (L, d_inner)
    z = xz[:, d_inner:]                                                   # (L, d_inner)

    # Depthwise causal conv1d + SiLU: sublane rolls (XLU) + causal mask, no padded scratch.
    convw = conv_w_ref[...]                                               # (d_conv, d_inner)
    row_idx = jax.lax.broadcasted_iota(jnp.int32, (seqlen, d_inner), 0)
    acc = jnp.zeros((seqlen, d_inner), jnp.float32) + conv_b_ref[...]
    for w in range(d_conv):
        shift = d_conv - 1 - w                     # y[l] += x[l - shift] * convw[w]
        if shift == 0:
            xw = xs
        else:
            xw = pltpu.roll(xs, shift=shift, axis=0)
            xw = jnp.where(row_idx >= shift, xw, 0.0)
        acc = acc + xw * convw[w:w + 1, :]
    x_act = _silu(acc)                                                    # (L, d_inner)

    # Fused x_proj: columns ordered [B | C | dt_lowrank] -> one MXU matmul, no transposes.
    xdbl = jnp.dot(x_act, wx_ref[...], preferred_element_type=jnp.float32)  # (L, 2*ds+dt_rank)
    b_mat = xdbl[:, :d_state]                                               # (L, d_state)
    c_mat = xdbl[:, d_state:2 * d_state]                                    # (L, d_state)
    dt_lr = xdbl[:, 2 * d_state:]                                           # (L, dt_rank)

    # dt_proj (K = dt_rank, tiny): VPU broadcast-FMAs instead of an MXU push.
    wdt = wdt_ref[...]
    dt_pre = jnp.zeros((seqlen, d_inner), jnp.float32) + dtb_ref[...]
    for r in range(dt_rank):
        dt_pre = dt_pre + dt_lr[:, r:r + 1] * wdt[r:r + 1, :]
    dt = _softplus(dt_pre)                                                  # (L, d_inner)

    # Selective scan. exp(dt*A) and dt*u*B hoisted out of the serial recurrence so the
    # loop body is a single VPU FMA; h per step written to an aligned VMEM slice, with the
    # C contraction done once (batched) after the loop.
    a_t = a_t_ref[...]                                                      # (d_state, d_inner)
    dA_all = jnp.exp(dt[:, None, :] * a_t[None, :, :])                      # (L, ds, d_inner)
    dBu_all = (dt * x_act)[:, None, :] * b_mat[:, :, None]                  # (L, ds, d_inner)
    h = jnp.zeros((d_state, d_inner), jnp.float32)
    # TODO(synk): for real block_size (1024) switch this unrolled loop to
    # lax.fori_loop(..., unroll=4..8) with dA_all/dBu_all staged in VMEM chunks.
    for l in range(seqlen):
        h = h * dA_all[l] + dBu_all[l]
        h_scr[l] = h
    y_ssm = jnp.sum(h_scr[...] * c_mat[:, :, None], axis=1)                 # (L, d_inner)

    y = (y_ssm + d_ref[...] * x_act) * _silu(z)                             # D skip + gate
    x1 = x0 + jnp.dot(y, w_out_ref[...], preferred_element_type=jnp.float32)  # residual 1

    # ---------------- ln_2 + MLP ----------------
    xn2 = _layernorm_vals(x1, ln2_w_ref[...], ln2_b_ref[...])
    hid = jnp.dot(xn2, w1_ref[...], preferred_element_type=jnp.float32) + b1_ref[...]
    hid = _gelu_exact(hid)
    out = jnp.dot(hid, w2_ref[...], preferred_element_type=jnp.float32) + b2_ref[...]
    x2 = x1 + out                                                           # residual 2
    res_scr[...] = x2

    # ---------------- last layer: fused ln_f + score on the last token ----------------
    @pl.when(layer == n_layer - 1)
    def _():
        x_last = x2[seqlen - 1:seqlen, :]                                   # (1, D)
        xf = _layernorm_vals(x_last, lnf_w_ref[...], lnf_b_ref[...])
        logits_ref[...] = jnp.dot(xf, score_w_ref[...],
                                  preferred_element_type=jnp.float32).astype(logits_ref.dtype)


# ----------------------------- pallas_call wrapper --------------------------------------
def mamba_forward(params, idx):
    bsz, t = idx.shape
    tok_emb = jnp.take(params["wte"], idx, axis=0)            # (B, T, D)  embedding gather
    pos_emb = params["wpe"][:t]                               # (T, D)
    x = (tok_emb + pos_emb[None]).astype(jnp.float32)         # dropout p=0.0 -> identity

    kernel = functools.partial(_fused_kernel, seqlen=t, d_conv=D_CONV, d_inner=D_INNER,
                               d_state=D_STATE, dt_rank=DT_RANK, n_layer=N_LAYER)

    # Per-layer weight: stacked (N_LAYER, ...), layer axis selected by the grid.
    def lspec(shape):
        return pl.BlockSpec((None,) + shape, lambda b, l: (l,) + (0,) * len(shape))

    # Global (layer-independent) weight.
    def gspec(shape):
        return pl.BlockSpec(shape, lambda b, l: (0,) * len(shape))

    x_spec = pl.BlockSpec((None, t, N_EMBD), lambda b, l: (b, 0, 0))
    logits_spec = pl.BlockSpec((None, 1, N_CLASSES), lambda b, l: (b, 0, 0))

    logits3 = pl.pallas_call(
        kernel,
        out_shape=jax.ShapeDtypeStruct((bsz, 1, N_CLASSES), jnp.float32),
        grid=(bsz, N_LAYER),
        in_specs=[
            x_spec,
            lspec((1, N_EMBD)), lspec((1, N_EMBD)),                    # ln1 w, b
            lspec((N_EMBD, 2 * D_INNER)),                              # in_proj
            lspec((D_CONV, D_INNER)), lspec((1, D_INNER)),             # conv w, b
            lspec((D_INNER, 2 * D_STATE + DT_RANK)),                   # x_proj [B|C|dt]
            lspec((DT_RANK, D_INNER)), lspec((1, D_INNER)),            # dt_proj w, bias
            lspec((D_STATE, D_INNER)),                                 # A (transposed)
            lspec((1, D_INNER)),                                       # D
            lspec((D_INNER, N_EMBD)),                                  # out_proj
            lspec((1, N_EMBD)), lspec((1, N_EMBD)),                    # ln2 w, b
            lspec((N_EMBD, 4 * N_EMBD)), lspec((1, 4 * N_EMBD)),       # mlp c_fc
            lspec((4 * N_EMBD, N_EMBD)), lspec((1, N_EMBD)),           # mlp c_proj
            gspec((1, N_EMBD)), gspec((1, N_EMBD)),                    # ln_f w, b
            gspec((N_EMBD, N_CLASSES)),                                # score head
        ],
        out_specs=logits_spec,
        scratch_shapes=[
            pltpu.VMEM((t, N_EMBD), jnp.float32),                      # resident residual
            pltpu.VMEM((t, D_STATE, D_INNER), jnp.float32),            # per-step scan states
        ],
        compiler_params=pltpu.CompilerParams(
            dimension_semantics=("parallel", "arbitrary")),
        # TODO(synk): at the real config (n_embd=768, n_layer=12) also set
        # vmem_limit_bytes here and use bf16 weights / pl.Buffered(1) weight specs
        # to fit v7x's 64 MiB VMEM.
    )(x,
      params["ln1_w"], params["ln1_b"],
      params["w_in_t"], params["conv_w_t"], params["conv_b"],
      params["wx_all"], params["wdt_t"], params["dt_bias"],
      params["A_t"], params["D"], params["w_out_t"],
      params["ln2_w"], params["ln2_b"],
      params["mlp_w1"], params["mlp_b1"], params["mlp_w2"], params["mlp_b2"],
      params["lnf_w"], params["lnf_b"], params["score_w_t"])

    return logits3[:, 0, :]                                            # (B, N_CLASSES)


# ----------------------------- deterministic parameter init ------------------------------
def _xavier(key, shape):
    fan_in, fan_out = shape[0], shape[1]
    a = math.sqrt(6.0 / (fan_in + fan_out))
    return jax.random.uniform(key, shape, jnp.float32, -a, a)


def init_params(key):
    keys = jax.random.split(key, 3 + N_LAYER)
    params = {
        "wte": 0.02 * jax.random.normal(keys[0], (VOCAB, N_EMBD), jnp.float32),
        "wpe": 0.02 * jax.random.normal(keys[1], (BLOCK_SIZE, N_EMBD), jnp.float32),
        "lnf_w": jnp.ones((1, N_EMBD), jnp.float32),
        "lnf_b": jnp.zeros((1, N_EMBD), jnp.float32),
        "score_w_t": _xavier(keys[2], (N_EMBD, N_CLASSES)),
    }
    layers = []
    for li in range(N_LAYER):
        lk = jax.random.split(keys[3 + li], 10)
        wx_dt = _xavier(lk[3], (D_INNER, DT_RANK))
        wx_B = _xavier(lk[4], (D_INNER, D_STATE))
        wx_C = _xavier(lk[5], (D_INNER, D_STATE))
        layer = {
            "ln1_w": jnp.ones((1, N_EMBD), jnp.float32),
            "ln1_b": jnp.zeros((1, N_EMBD), jnp.float32),
            "ln2_w": jnp.ones((1, N_EMBD), jnp.float32),
            "ln2_b": jnp.zeros((1, N_EMBD), jnp.float32),
            # Mamba
            "w_in_t": _xavier(lk[0], (N_EMBD, 2 * D_INNER)),
            "conv_w_t": jax.random.uniform(lk[1], (D_CONV, D_INNER), jnp.float32, -0.5, 0.5),
            "conv_b": jax.random.uniform(lk[2], (1, D_INNER), jnp.float32, -0.5, 0.5),
            # fused x_proj weight, columns ordered [B | C | dt_lowrank]
            "wx_all": jnp.concatenate([wx_B, wx_C, wx_dt], axis=1),
            "wdt_t": _xavier(lk[6], (DT_RANK, D_INNER)),
            "dt_bias": jnp.zeros((1, D_INNER), jnp.float32),   # zeroed by _init_weights
            # A = -exp(A_log), A_log = log(broadcast(arange(1, d_state+1))); stored transposed
            "A_t": -jnp.broadcast_to(
                jnp.arange(1, D_STATE + 1, dtype=jnp.float32)[:, None], (D_STATE, D_INNER)),
            "D": jnp.ones((1, D_INNER), jnp.float32),
            "w_out_t": _xavier(lk[7], (D_INNER, N_EMBD)),
            # MLP
            "mlp_w1": _xavier(lk[8], (N_EMBD, 4 * N_EMBD)),
            "mlp_b1": jnp.zeros((1, 4 * N_EMBD), jnp.float32),
            "mlp_w2": _xavier(lk[9], (4 * N_EMBD, N_EMBD)),
            "mlp_b2": jnp.zeros((1, N_EMBD), jnp.float32),
        }
        layers.append(layer)
    # Stack every per-layer tensor along a leading (N_LAYER) axis for layer-indexed prefetch.
    for name in layers[0]:
        params[name] = jnp.stack([ly[name] for ly in layers], axis=0)
    return params


# ----------------------------- main -------------------------------------------------------
if __name__ == "__main__":
    root = jax.random.PRNGKey(0)
    k_idx, k_par = jax.random.split(root)
    B, T = 2, 8
    idx = jax.random.randint(k_idx, (B, T), 0, VOCAB, dtype=jnp.int32)
    params = init_params(k_par)

    logits = jax.jit(mamba_forward)(params, idx)
    logits = jax.block_until_ready(logits)
    assert logits.shape == (B, N_CLASSES), logits.shape
    assert bool(jnp.all(jnp.isfinite(logits)))
    print("KERNEL_OK")
</pallas_src>

<mosaic_0001>
module attributes {stable_mosaic.version = 11 : i64} {
  func.func @_fused_kernel(%arg0: i32, %arg1: i32, %arg2: memref<1x8x32xf32, #tpu.memory_space<vmem>>, %arg3: memref<1x1x32xf32, #tpu.memory_space<vmem>>, %arg4: memref<1x1x32xf32, #tpu.memory_space<vmem>>, %arg5: memref<1x32x128xf32, #tpu.memory_space<vmem>>, %arg6: memref<1x4x64xf32, #tpu.memory_space<vmem>>, %arg7: memref<1x1x64xf32, #tpu.memory_space<vmem>>, %arg8: memref<1x64x34xf32, #tpu.memory_space<vmem>>, %arg9: memref<1x2x64xf32, #tpu.memory_space<vmem>>, %arg10: memref<1x1x64xf32, #tpu.memory_space<vmem>>, %arg11: memref<1x16x64xf32, #tpu.memory_space<vmem>>, %arg12: memref<1x1x64xf32, #tpu.memory_space<vmem>>, %arg13: memref<1x64x32xf32, #tpu.memory_space<vmem>>, %arg14: memref<1x1x32xf32, #tpu.memory_space<vmem>>, %arg15: memref<1x1x32xf32, #tpu.memory_space<vmem>>, %arg16: memref<1x32x128xf32, #tpu.memory_space<vmem>>, %arg17: memref<1x1x128xf32, #tpu.memory_space<vmem>>, %arg18: memref<1x128x32xf32, #tpu.memory_space<vmem>>, %arg19: memref<1x1x32xf32, #tpu.memory_space<vmem>>, %arg20: memref<1x32xf32, #tpu.memory_space<vmem>>, %arg21: memref<1x32xf32, #tpu.memory_space<vmem>>, %arg22: memref<32x5xf32, #tpu.memory_space<vmem>>, %arg23: memref<1x1x5xf32, #tpu.memory_space<vmem>>, %arg24: memref<8x32xf32, #tpu.memory_space<vmem>>, %arg25: memref<8x16x64xf32, #tpu.memory_space<vmem>>) attributes {dimension_semantics = [#tpu.dimension_semantics<parallel>, #tpu.dimension_semantics<arbitrary>], iteration_bounds = array<i64: 2, 2>, scalar_prefetch = 0 : i64, scratch_operands = 2 : i64, tpu.core_type = #tpu.core_type<tc>, window_params = [{transform_indices = @transform_0, window_bounds = array<i64: 1, 8, 32>}, {transform_indices = @transform_1, window_bounds = array<i64: 1, 1, 32>}, {transform_indices = @transform_2, window_bounds = array<i64: 1, 1, 32>}, {transform_indices = @transform_3, window_bounds = array<i64: 1, 32, 128>}, {transform_indices = @transform_4, window_bounds = array<i64: 1, 4, 64>}, {transform_indices = @transform_5, window_bounds = array<i64: 1, 1, 64>}, {transform_indices = @transform_6, window_bounds = array<i64: 1, 64, 34>}, {transform_indices = @transform_7, window_bounds = array<i64: 1, 2, 64>}, {transform_indices = @transform_8, window_bounds = array<i64: 1, 1, 64>}, {transform_indices = @transform_9, window_bounds = array<i64: 1, 16, 64>}, {transform_indices = @transform_10, window_bounds = array<i64: 1, 1, 64>}, {transform_indices = @transform_11, window_bounds = array<i64: 1, 64, 32>}, {transform_indices = @transform_12, window_bounds = array<i64: 1, 1, 32>}, {transform_indices = @transform_13, window_bounds = array<i64: 1, 1, 32>}, {transform_indices = @transform_14, window_bounds = array<i64: 1, 32, 128>}, {transform_indices = @transform_15, window_bounds = array<i64: 1, 1, 128>}, {transform_indices = @transform_16, window_bounds = array<i64: 1, 128, 32>}, {transform_indices = @transform_17, window_bounds = array<i64: 1, 1, 32>}, {pipeline_mode = #tpu.pipeline_mode<synchronous>, transform_indices = @transform_18, window_bounds = array<i64: 1, 32>}, {pipeline_mode = #tpu.pipeline_mode<synchronous>, transform_indices = @transform_19, window_bounds = array<i64: 1, 32>}, {pipeline_mode = #tpu.pipeline_mode<synchronous>, transform_indices = @transform_20, window_bounds = array<i64: 32, 5>}, {transform_indices = @transform_21, window_bounds = array<i64: 1, 1, 5>}]} {
    %c0_i32 = arith.constant 0 : i32
    %0 = arith.cmpi eq, %arg1, %c0_i32 : i32
    %1 = arith.extui %0 : i1 to i32
    %c0_i32_0 = arith.constant 0 : i32
    %2 = arith.cmpi ne, %1, %c0_i32_0 : i32
    scf.if %2 {
      %c0_126 = arith.constant 0 : index
      %c0_127 = arith.constant 0 : index
      %c0_128 = arith.constant 0 : index
      %309 = vector.load %arg2[%c0_126, %c0_127, %c0_128] : memref<1x8x32xf32, #tpu.memory_space<vmem>>, vector<1x8x32xf32>
      %310 = vector.shape_cast %309 : vector<1x8x32xf32> to vector<8x32xf32>
      %c0_129 = arith.constant 0 : index
      %c0_130 = arith.constant 0 : index
      %311 = vector.load %arg24[%c0_129, %c0_130] : memref<8x32xf32, #tpu.memory_space<vmem>>, vector<8x32xf32>
      tpu.vector_store %arg24[%c0_129, %c0_130], %310 {strides = array<i32>} : memref<8x32xf32, #tpu.memory_space<vmem>>, vector<8x32xf32>,
    } else {
    }
    %c0 = arith.constant 0 : index
    %c0_1 = arith.constant 0 : index
    %3 = vector.load %arg24[%c0, %c0_1] : memref<8x32xf32, #tpu.memory_space<vmem>>, vector<8x32xf32>
    %c0_2 = arith.constant 0 : index
    %c0_3 = arith.constant 0 : index
    %c0_4 = arith.constant 0 : index
    %4 = vector.load %arg3[%c0_2, %c0_3, %c0_4] : memref<1x1x32xf32, #tpu.memory_space<vmem>>, vector<1x1x32xf32>
    %5 = vector.shape_cast %4 : vector<1x1x32xf32> to vector<1x32xf32>
    %c0_5 = arith.constant 0 : index
    %c0_6 = arith.constant 0 : index
    %c0_7 = arith.constant 0 : index
    %6 = vector.load %arg4[%c0_5, %c0_6, %c0_7] : memref<1x1x32xf32, #tpu.memory_space<vmem>>, vector<1x1x32xf32>
    %7 = vector.shape_cast %6 : vector<1x1x32xf32> to vector<1x32xf32>
    %cst = arith.constant dense<0.000000e+00> : vector<8xf32>
    %8 = vector.multi_reduction <add>, %3, %cst [1] : vector<8x32xf32> to vector<8xf32>
    %9 = vector.shape_cast %8 : vector<8xf32> to vector<8x1xf32>
    %cst_8 = arith.constant 3.200000e+01 : f32
    %10 = vector.broadcast %cst_8 : f32 to vector<8x1xf32>
    %11 = arith.divf %9, %10 : vector<8x1xf32>
    %12 = vector.broadcast %11 : vector<8x1xf32> to vector<8x32xf32>
    %13 = arith.subf %3, %12 : vector<8x32xf32>
    %14 = arith.mulf %13, %13 : vector<8x32xf32>
    %cst_9 = arith.constant dense<0.000000e+00> : vector<8xf32>
    %15 = vector.multi_reduction <add>, %14, %cst_9 [1] : vector<8x32xf32> to vector<8xf32>
    %16 = vector.shape_cast %15 : vector<8xf32> to vector<8x1xf32>
    %cst_10 = arith.constant 3.200000e+01 : f32
    %17 = vector.broadcast %cst_10 : f32 to vector<8x1xf32>
    %18 = arith.divf %16, %17 : vector<8x1xf32>
    %cst_11 = arith.constant 9.99999974E-6 : f32
    %19 = vector.broadcast %cst_11 : f32 to vector<8x1xf32>
    %20 = arith.addf %18, %19 : vector<8x1xf32>
    %21 = math.rsqrt %20 : vector<8x1xf32>
    %22 = vector.broadcast %21 : vector<8x1xf32> to vector<8x32xf32>
    %23 = arith.mulf %13, %22 : vector<8x32xf32>
    %24 = vector.broadcast %5 : vector<1x32xf32> to vector<8x32xf32>
    %25 = arith.mulf %23, %24 : vector<8x32xf32>
    %26 = vector.broadcast %7 : vector<1x32xf32> to vector<8x32xf32>
    %27 = arith.addf %25, %26 : vector<8x32xf32>
    %c0_12 = arith.constant 0 : index
    %c0_13 = arith.constant 0 : index
    %c0_14 = arith.constant 0 : index
    %28 = vector.load %arg5[%c0_12, %c0_13, %c0_14] : memref<1x32x128xf32, #tpu.memory_space<vmem>>, vector<1x32x128xf32>
    %29 = vector.shape_cast %28 : vector<1x32x128xf32> to vector<32x128xf32>
    %cst_15 = arith.constant dense<0.000000e+00> : vector<8x128xf32>
    %30 = tpu.matmul %27, %29, %cst_15 {dimension_numbers = #tpu.dot_dimension_numbers<[1], [0], [0], [1], [0, 0, 1, 1], [], []>} : vector<8x32xf32>, vector<32x128xf32>, vector<8x128xf32> -> vector<8x128xf32>
    %31 = vector.extract_strided_slice %30 {offsets = [0, 0], sizes = [8, 64], strides = [1, 1]} : vector<8x128xf32> to vector<8x64xf32>
    %32 = vector.extract_strided_slice %30 {offsets = [0, 64], sizes = [8, 64], strides = [1, 1]} : vector<8x128xf32> to vector<8x64xf32>
    %c0_16 = arith.constant 0 : index
    %c0_17 = arith.constant 0 : index
    %c0_18 = arith.constant 0 : index
    %33 = vector.load %arg6[%c0_16, %c0_17, %c0_18] : memref<1x4x64xf32, #tpu.memory_space<vmem>>, vector<1x4x64xf32>
    %34 = vector.shape_cast %33 : vector<1x4x64xf32> to vector<4x64xf32>
    %35 = tpu.iota {dimensions = array<i32: 0>} : vector<8x64xi32>
    %cst_19 = arith.constant 0.000000e+00 : f32
    %36 = vector.broadcast %cst_19 : f32 to vector<8x64xf32>
    %c0_20 = arith.constant 0 : index
    %c0_21 = arith.constant 0 : index
    %c0_22 = arith.constant 0 : index
    %37 = vector.load %arg7[%c0_20, %c0_21, %c0_22] : memref<1x1x64xf32, #tpu.memory_space<vmem>>, vector<1x1x64xf32>
    %38 = vector.shape_cast %37 : vector<1x1x64xf32> to vector<1x64xf32>
    %39 = vector.broadcast %38 : vector<1x64xf32> to vector<8x64xf32>
    %40 = arith.addf %36, %39 : vector<8x64xf32>
    %c3_i32 = arith.constant 3 : i32
    %41 = tpu.dynamic_rotate %31 by %c3_i32 dim 0 : vector<8x64xf32>, i32 -> vector<8x64xf32>
    %c3_i32_23 = arith.constant 3 : i32
    %42 = vector.broadcast %c3_i32_23 : i32 to vector<8x64xi32>
    %43 = arith.cmpi sge, %35, %42 : vector<8x64xi32>
    %cst_24 = arith.constant 0.000000e+00 : f32
    %44 = vector.broadcast %cst_24 : f32 to vector<8x64xf32>
    %45 = arith.select %43, %41, %44 : vector<8x64xi1>, vector<8x64xf32>
    %46 = vector.extract_strided_slice %34 {offsets = [0, 0], sizes = [1, 64], strides = [1, 1]} : vector<4x64xf32> to vector<1x64xf32>
    %47 = vector.broadcast %46 : vector<1x64xf32> to vector<8x64xf32>
    %48 = arith.mulf %45, %47 : vector<8x64xf32>
    %49 = arith.addf %40, %48 : vector<8x64xf32>
    %c2_i32 = arith.constant 2 : i32
    %50 = tpu.dynamic_rotate %31 by %c2_i32 dim 0 : vector<8x64xf32>, i32 -> vector<8x64xf32>
    %c2_i32_25 = arith.constant 2 : i32
    %51 = vector.broadcast %c2_i32_25 : i32 to vector<8x64xi32>
    %52 = arith.cmpi sge, %35, %51 : vector<8x64xi32>
    %cst_26 = arith.constant 0.000000e+00 : f32
    %53 = vector.broadcast %cst_26 : f32 to vector<8x64xf32>
    %54 = arith.select %52, %50, %53 : vector<8x64xi1>, vector<8x64xf32>
    %55 = vector.extract_strided_slice %34 {offsets = [1, 0], sizes = [1, 64], strides = [1, 1]} : vector<4x64xf32> to vector<1x64xf32>
    %56 = vector.broadcast %55 : vector<1x64xf32> to vector<8x64xf32>
    %57 = arith.mulf %54, %56 : vector<8x64xf32>
    %58 = arith.addf %49, %57 : vector<8x64xf32>
    %c1_i32 = arith.constant 1 : i32
    %59 = tpu.dynamic_rotate %31 by %c1_i32 dim 0 : vector<8x64xf32>, i32 -> vector<8x64xf32>
    %c1_i32_27 = arith.constant 1 : i32
    %60 = vector.broadcast %c1_i32_27 : i32 to vector<8x64xi32>
    %61 = arith.cmpi sge, %35, %60 : vector<8x64xi32>
    %cst_28 = arith.constant 0.000000e+00 : f32
    %62 = vector.broadcast %cst_28 : f32 to vector<8x64xf32>
    %63 = arith.select %61, %59, %62 : vector<8x64xi1>, vector<8x64xf32>
    %64 = vector.extract_strided_slice %34 {offsets = [2, 0], sizes = [1, 64], strides = [1, 1]} : vector<4x64xf32> to vector<1x64xf32>
    %65 = vector.broadcast %64 : vector<1x64xf32> to vector<8x64xf32>
    %66 = arith.mulf %63, %65 : vector<8x64xf32>
    %67 = arith.addf %58, %66 : vector<8x64xf32>
    %68 = vector.extract_strided_slice %34 {offsets = [3, 0], sizes = [1, 64], strides = [1, 1]} : vector<4x64xf32> to vector<1x64xf32>
    %69 = vector.broadcast %68 : vector<1x64xf32> to vector<8x64xf32>
    %70 = arith.mulf %31, %69 : vector<8x64xf32>
    %71 = arith.addf %67, %70 : vector<8x64xf32>
    %cst_29 = arith.constant 0.000000e+00 : f32
    %72 = vector.broadcast %cst_29 : f32 to vector<8x64xf32>
    %73 = arith.subf %72, %71 : vector<8x64xf32>
    %74 = math.exp %73 : vector<8x64xf32>
    %cst_30 = arith.constant 1.000000e+00 : f32
    %75 = vector.broadcast %cst_30 : f32 to vector<8x64xf32>
    %76 = arith.addf %75, %74 : vector<8x64xf32>
    %cst_31 = arith.constant 1.000000e+00 : f32
    %77 = vector.broadcast %cst_31 : f32 to vector<8x64xf32>
    %78 = arith.divf %77, %76 : vector<8x64xf32>
    %79 = arith.mulf %71, %78 : vector<8x64xf32>
    %c0_32 = arith.constant 0 : index
    %c0_33 = arith.constant 0 : index
    %c0_34 = arith.constant 0 : index
    %80 = vector.load %arg8[%c0_32, %c0_33, %c0_34] : memref<1x64x34xf32, #tpu.memory_space<vmem>>, vector<1x64x34xf32>
    %81 = vector.shape_cast %80 : vector<1x64x34xf32> to vector<64x34xf32>
    %cst_35 = arith.constant dense<0.000000e+00> : vector<8x34xf32>
    %82 = tpu.matmul %79, %81, %cst_35 {dimension_numbers = #tpu.dot_dimension_numbers<[1], [0], [0], [1], [0, 0, 1, 1], [], []>} : vector<8x64xf32>, vector<64x34xf32>, vector<8x34xf32> -> vector<8x34xf32>
    %83 = vector.extract_strided_slice %82 {offsets = [0, 0], sizes = [8, 16], strides = [1, 1]} : vector<8x34xf32> to vector<8x16xf32>
    %84 = vector.extract_strided_slice %82 {offsets = [0, 16], sizes = [8, 16], strides = [1, 1]} : vector<8x34xf32> to vector<8x16xf32>
    %85 = vector.extract_strided_slice %82 {offsets = [0, 32], sizes = [8, 2], strides = [1, 1]} : vector<8x34xf32> to vector<8x2xf32>
    %c0_36 = arith.constant 0 : index
    %c0_37 = arith.constant 0 : index
    %c0_38 = arith.constant 0 : index
    %86 = vector.load %arg9[%c0_36, %c0_37, %c0_38] : memref<1x2x64xf32, #tpu.memory_space<vmem>>, vector<1x2x64xf32>
    %87 = vector.shape_cast %86 : vector<1x2x64xf32> to vector<2x64xf32>
    %cst_39 = arith.constant 0.000000e+00 : f32
    %88 = vector.broadcast %cst_39 : f32 to vector<8x64xf32>
    %c0_40 = arith.constant 0 : index
    %c0_41 = arith.constant 0 : index
    %c0_42 = arith.constant 0 : index
    %89 = vector.load %arg10[%c0_40, %c0_41, %c0_42] : memref<1x1x64xf32, #tpu.memory_space<vmem>>, vector<1x1x64xf32>
    %90 = vector.shape_cast %89 : vector<1x1x64xf32> to vector<1x64xf32>
    %91 = vector.broadcast %90 : vector<1x64xf32> to vector<8x64xf32>
    %92 = arith.addf %88, %91 : vector<8x64xf32>
    %93 = vector.extract_strided_slice %85 {offsets = [0, 0], sizes = [8, 1], strides = [1, 1]} : vector<8x2xf32> to vector<8x1xf32>
    %94 = vector.extract_strided_slice %87 {offsets = [0, 0], sizes = [1, 64], strides = [1, 1]} : vector<2x64xf32> to vector<1x64xf32>
    %95 = vector.broadcast %93 : vector<8x1xf32> to vector<8x64xf32>
    %96 = vector.broadcast %94 : vector<1x64xf32> to vector<8x64xf32>
    %97 = arith.mulf %95, %96 : vector<8x64xf32>
    %98 = arith.addf %92, %97 : vector<8x64xf32>
    %99 = vector.extract_strided_slice %85 {offsets = [0, 1], sizes = [8, 1], strides = [1, 1]} : vector<8x2xf32> to vector<8x1xf32>
    %100 = vector.extract_strided_slice %87 {offsets = [1, 0], sizes = [1, 64], strides = [1, 1]} : vector<2x64xf32> to vector<1x64xf32>
    %101 = vector.broadcast %99 : vector<8x1xf32> to vector<8x64xf32>
    %102 = vector.broadcast %100 : vector<1x64xf32> to vector<8x64xf32>
    %103 = arith.mulf %101, %102 : vector<8x64xf32>
    %104 = arith.addf %98, %103 : vector<8x64xf32>
    %cst_43 = arith.constant 0.000000e+00 : f32
    %105 = vector.broadcast %cst_43 : f32 to vector<8x64xf32>
    %106 = arith.maximumf %104, %105 : vector<8x64xf32>
    %107 = math.absf %104 : vector<8x64xf32>
    %cst_44 = arith.constant 0.000000e+00 : f32
    %108 = vector.broadcast %cst_44 : f32 to vector<8x64xf32>
    %109 = arith.subf %108, %107 : vector<8x64xf32>
    %110 = math.exp %109 : vector<8x64xf32>
    %cst_45 = arith.constant 1.000000e+00 : f32
    %111 = vector.broadcast %cst_45 : f32 to vector<8x64xf32>
    %112 = arith.addf %111, %110 : vector<8x64xf32>
    %113 = math.log %112 : vector<8x64xf32>
    %114 = arith.addf %106, %113 : vector<8x64xf32>
    %c0_46 = arith.constant 0 : index
    %c0_47 = arith.constant 0 : index
    %c0_48 = arith.constant 0 : index
    %115 = vector.load %arg11[%c0_46, %c0_47, %c0_48] : memref<1x16x64xf32, #tpu.memory_space<vmem>>, vector<1x16x64xf32>
    %116 = vector.shape_cast %115 : vector<1x16x64xf32> to vector<16x64xf32>
    %117 = vector.shape_cast %114 : vector<8x64xf32> to vector<8x1x64xf32>
    %118 = vector.shape_cast %116 : vector<16x64xf32> to vector<1x16x64xf32>
    %119 = vector.broadcast %117 : vector<8x1x64xf32> to vector<8x16x64xf32>
    %120 = vector.broadcast %118 : vector<1x16x64xf32> to vector<8x16x64xf32>
    %121 = arith.mulf %119, %120 : vector<8x16x64xf32>
    %122 = math.exp %121 : vector<8x16x64xf32>
    %123 = arith.mulf %114, %79 : vector<8x64xf32>
    %124 = vector.shape_cast %123 : vector<8x64xf32> to vector<8x1x64xf32>
    %125 = vector.shape_cast %83 : vector<8x16xf32> to vector<8x16x1xf32>
    %126 = vector.broadcast %124 : vector<8x1x64xf32> to vector<8x16x64xf32>
    %127 = vector.broadcast %125 : vector<8x16x1xf32> to vector<8x16x64xf32>
    %128 = arith.mulf %126, %127 : vector<8x16x64xf32>
    %cst_49 = arith.constant 0.000000e+00 : f32
    %129 = vector.broadcast %cst_49 : f32 to vector<16x64xf32>
    %130 = vector.extract_strided_slice %122 {offsets = [0, 0, 0], sizes = [1, 16, 64], strides = [1, 1, 1]} : vector<8x16x64xf32> to vector<1x16x64xf32>
    %131 = vector.shape_cast %130 : vector<1x16x64xf32> to vector<16x64xf32>
    %132 = arith.mulf %129, %131 : vector<16x64xf32>
    %133 = vector.extract_strided_slice %128 {offsets = [0, 0, 0], sizes = [1, 16, 64], strides = [1, 1, 1]} : vector<8x16x64xf32> to vector<1x16x64xf32>
    %134 = vector.shape_cast %133 : vector<1x16x64xf32> to vector<16x64xf32>
    %135 = arith.addf %132, %134 : vector<16x64xf32>
    %c0_50 = arith.constant 0 : index
    %c0_51 = arith.constant 0 : index
    %c0_52 = arith.constant 0 : index
    %136 = vector.load %arg25[%c0_50, %c0_51, %c0_52] : memref<8x16x64xf32, #tpu.memory_space<vmem>>, vector<1x16x64xf32>
    %137 = vector.shape_cast %136 : vector<1x16x64xf32> to vector<16x64xf32>
    %138 = vector.shape_cast %135 : vector<16x64xf32> to vector<1x16x64xf32>
    tpu.vector_store %arg25[%c0_50, %c0_51, %c0_52], %138 {strides = array<i32>} : memref<8x16x64xf32, #tpu.memory_space<vmem>>, vector<1x16x64xf32>,
    %139 = vector.extract_strided_slice %122 {offsets = [1, 0, 0], sizes = [1, 16, 64], strides = [1, 1, 1]} : vector<8x16x64xf32> to vector<1x16x64xf32>
    %140 = vector.shape_cast %139 : vector<1x16x64xf32> to vector<16x64xf32>
    %141 = arith.mulf %135, %140 : vector<16x64xf32>
    %142 = vector.extract_strided_slice %128 {offsets = [1, 0, 0], sizes = [1, 16, 64], strides = [1, 1, 1]} : vector<8x16x64xf32> to vector<1x16x64xf32>
    %143 = vector.shape_cast %142 : vector<1x16x64xf32> to vector<16x64xf32>
    %144 = arith.addf %141, %143 : vector<16x64xf32>
    %c1 = arith.constant 1 : index
    %c0_53 = arith.constant 0 : index
    %c0_54 = arith.constant 0 : index
    %145 = vector.load %arg25[%c1, %c0_53, %c0_54] : memref<8x16x64xf32, #tpu.memory_space<vmem>>, vector<1x16x64xf32>
    %146 = vector.shape_cast %145 : vector<1x16x64xf32> to vector<16x64xf32>
    %147 = vector.shape_cast %144 : vector<16x64xf32> to vector<1x16x64xf32>
    tpu.vector_store %arg25[%c1, %c0_53, %c0_54], %147 {strides = array<i32>} : memref<8x16x64xf32, #tpu.memory_space<vmem>>, vector<1x16x64xf32>,
    %148 = vector.extract_strided_slice %122 {offsets = [2, 0, 0], sizes = [1, 16, 64], strides = [1, 1, 1]} : vector<8x16x64xf32> to vector<1x16x64xf32>
    %149 = vector.shape_cast %148 : vector<1x16x64xf32> to vector<16x64xf32>
    %150 = arith.mulf %144, %149 : vector<16x64xf32>
    %151 = vector.extract_strided_slice %128 {offsets = [2, 0, 0], sizes = [1, 16, 64], strides = [1, 1, 1]} : vector<8x16x64xf32> to vector<1x16x64xf32>
    %152 = vector.shape_cast %151 : vector<1x16x64xf32> to vector<16x64xf32>
    %153 = arith.addf %150, %152 : vector<16x64xf32>
    %c2 = arith.constant 2 : index
    %c0_55 = arith.constant 0 : index
    %c0_56 = arith.constant 0 : index
    %154 = vector.load %arg25[%c2, %c0_55, %c0_56] : memref<8x16x64xf32, #tpu.memory_space<vmem>>, vector<1x16x64xf32>
    %155 = vector.shape_cast %154 : vector<1x16x64xf32> to vector<16x64xf32>
    %156 = vector.shape_cast %153 : vector<16x64xf32> to vector<1x16x64xf32>
    tpu.vector_store %arg25[%c2, %c0_55, %c0_56], %156 {strides = array<i32>} : memref<8x16x64xf32, #tpu.memory_space<vmem>>, vector<1x16x64xf32>,
    %157 = vector.extract_strided_slice %122 {offsets = [3, 0, 0], sizes = [1, 16, 64], strides = [1, 1, 1]} : vector<8x16x64xf32> to vector<1x16x64xf32>
    %158 = vector.shape_cast %157 : vector<1x16x64xf32> to vector<16x64xf32>
    %159 = arith.mulf %153, %158 : vector<16x64xf32>
    %160 = vector.extract_strided_slice %128 {offsets = [3, 0, 0], sizes = [1, 16, 64], strides = [1, 1, 1]} : vector<8x16x64xf32> to vector<1x16x64xf32>
    %161 = vector.shape_cast %160 : vector<1x16x64xf32> to vector<16x64xf32>
    %162 = arith.addf %159, %161 : vector<16x64xf32>
    %c3 = arith.constant 3 : index
    %c0_57 = arith.constant 0 : index
    %c0_58 = arith.constant 0 : index
    %163 = vector.load %arg25[%c3, %c0_57, %c0_58] : memref<8x16x64xf32, #tpu.memory_space<vmem>>, vector<1x16x64xf32>
    %164 = vector.shape_cast %163 : vector<1x16x64xf32> to vector<16x64xf32>
    %165 = vector.shape_cast %162 : vector<16x64xf32> to vector<1x16x64xf32>
    tpu.vector_store %arg25[%c3, %c0_57, %c0_58], %165 {strides = array<i32>} : memref<8x16x64xf32, #tpu.memory_space<vmem>>, vector<1x16x64xf32>,
    %166 = vector.extract_strided_slice %122 {offsets = [4, 0, 0], sizes = [1, 16, 64], strides = [1, 1, 1]} : vector<8x16x64xf32> to vector<1x16x64xf32>
    %167 = vector.shape_cast %166 : vector<1x16x64xf32> to vector<16x64xf32>
    %168 = arith.mulf %162, %167 : vector<16x64xf32>
    %169 = vector.extract_strided_slice %128 {offsets = [4, 0, 0], sizes = [1, 16, 64], strides = [1, 1, 1]} : vector<8x16x64xf32> to vector<1x16x64xf32>
    %170 = vector.shape_cast %169 : vector<1x16x64xf32> to vector<16x64xf32>
    %171 = arith.addf %168, %170 : vector<16x64xf32>
    %c4 = arith.constant 4 : index
    %c0_59 = arith.constant 0 : index
    %c0_60 = arith.constant 0 : index
    %172 = vector.load %arg25[%c4, %c0_59, %c0_60] : memref<8x16x64xf32, #tpu.memory_space<vmem>>, vector<1x16x64xf32>
    %173 = vector.shape_cast %172 : vector<1x16x64xf32> to vector<16x64xf32>
    %174 = vector.shape_cast %171 : vector<16x64xf32> to vector<1x16x64xf32>
    tpu.vector_store %arg25[%c4, %c0_59, %c0_60], %174 {strides = array<i32>} : memref<8x16x64xf32, #tpu.memory_space<vmem>>, vector<1x16x64xf32>,
    %175 = vector.extract_strided_slice %122 {offsets = [5, 0, 0], sizes = [1, 16, 64], strides = [1, 1, 1]} : vector<8x16x64xf32> to vector<1x16x64xf32>
    %176 = vector.shape_cast %175 : vector<1x16x64xf32> to vector<16x64xf32>
    %177 = arith.mulf %171, %176 : vector<16x64xf32>
    %178 = vector.extract_strided_slice %128 {offsets = [5, 0, 0], sizes = [1, 16, 64], strides = [1, 1, 1]} : vector<8x16x64xf32> to vector<1x16x64xf32>
    %179 = vector.shape_cast %178 : vector<1x16x64xf32> to vector<16x64xf32>
    %180 = arith.addf %177, %179 : vector<16x64xf32>
    %c5 = arith.constant 5 : index
    %c0_61 = arith.constant 0 : index
    %c0_62 = arith.constant 0 : index
    %181 = vector.load %arg25[%c5, %c0_61, %c0_62] : memref<8x16x64xf32, #tpu.memory_space<vmem>>, vector<1x16x64xf32>
    %182 = vector.shape_cast %181 : vector<1x16x64xf32> to vector<16x64xf32>
    %183 = vector.shape_cast %180 : vector<16x64xf32> to vector<1x16x64xf32>
    tpu.vector_store %arg25[%c5, %c0_61, %c0_62], %183 {strides = array<i32>} : memref<8x16x64xf32, #tpu.memory_space<vmem>>, vector<1x16x64xf32>,
    %184 = vector.extract_strided_slice %122 {offsets = [6, 0, 0], sizes = [1, 16, 64], strides = [1, 1, 1]} : vector<8x16x64xf32> to vector<1x16x64xf32>
    %185 = vector.shape_cast %184 : vector<1x16x64xf32> to vector<16x64xf32>
    %186 = arith.mulf %180, %185 : vector<16x64xf32>
    %187 = vector.extract_strided_slice %128 {offsets = [6, 0, 0], sizes = [1, 16, 64], strides = [1, 1, 1]} : vector<8x16x64xf32> to vector<1x16x64xf32>
    %188 = vector.shape_cast %187 : vector<1x16x64xf32> to vector<16x64xf32>
    %189 = arith.addf %186, %188 : vector<16x64xf32>
    %c6 = arith.constant 6 : index
    %c0_63 = arith.constant 0 : index
    %c0_64 = arith.constant 0 : index
    %190 = vector.load %arg25[%c6, %c0_63, %c0_64] : memref<8x16x64xf32, #tpu.memory_space<vmem>>, vector<1x16x64xf32>
    %191 = vector.shape_cast %190 : vector<1x16x64xf32> to vector<16x64xf32>
    %192 = vector.shape_cast %189 : vector<16x64xf32> to vector<1x16x64xf32>
    tpu.vector_store %arg25[%c6, %c0_63, %c0_64], %192 {strides = array<i32>} : memref<8x16x64xf32, #tpu.memory_space<vmem>>, vector<1x16x64xf32>,
    %193 = vector.extract_strided_slice %122 {offsets = [7, 0, 0], sizes = [1, 16, 64], strides = [1, 1, 1]} : vector<8x16x64xf32> to vector<1x16x64xf32>
    %194 = vector.shape_cast %193 : vector<1x16x64xf32> to vector<16x64xf32>
    %195 = arith.mulf %189, %194 : vector<16x64xf32>
    %196 = vector.extract_strided_slice %128 {offsets = [7, 0, 0], sizes = [1, 16, 64], strides = [1, 1, 1]} : vector<8x16x64xf32> to vector<1x16x64xf32>
    %197 = vector.shape_cast %196 : vector<1x16x64xf32> to vector<16x64xf32>
    %198 = arith.addf %195, %197 : vector<16x64xf32>
    %c7 = arith.constant 7 : index
    %c0_65 = arith.constant 0 : index
    %c0_66 = arith.constant 0 : index
    %199 = vector.load %arg25[%c7, %c0_65, %c0_66] : memref<8x16x64xf32, #tpu.memory_space<vmem>>, vector<1x16x64xf32>
    %200 = vector.shape_cast %199 : vector<1x16x64xf32> to vector<16x64xf32>
    %201 = vector.shape_cast %198 : vector<16x64xf32> to vector<1x16x64xf32>
    tpu.vector_store %arg25[%c7, %c0_65, %c0_66], %201 {strides = array<i32>} : memref<8x16x64xf32, #tpu.memory_space<vmem>>, vector<1x16x64xf32>,
    %c0_67 = arith.constant 0 : index
    %c0_68 = arith.constant 0 : index
    %c0_69 = arith.constant 0 : index
    %202 = vector.load %arg25[%c0_67, %c0_68, %c0_69] : memref<8x16x64xf32, #tpu.memory_space<vmem>>, vector<8x16x64xf32>
    %203 = vector.shape_cast %84 : vector<8x16xf32> to vector<8x16x1xf32>
    %204 = vector.broadcast %203 : vector<8x16x1xf32> to vector<8x16x64xf32>
    %205 = arith.mulf %202, %204 : vector<8x16x64xf32>
    %cst_70 = arith.constant dense<0.000000e+00> : vector<8x64xf32>
    %206 = vector.multi_reduction <add>, %205, %cst_70 [1] : vector<8x16x64xf32> to vector<8x64xf32>
    %c0_71 = arith.constant 0 : index
    %c0_72 = arith.constant 0 : index
    %c0_73 = arith.constant 0 : index
    %207 = vector.load %arg12[%c0_71, %c0_72, %c0_73] : memref<1x1x64xf32, #tpu.memory_space<vmem>>, vector<1x1x64xf32>
    %208 = vector.shape_cast %207 : vector<1x1x64xf32> to vector<1x64xf32>
    %209 = vector.broadcast %208 : vector<1x64xf32> to vector<8x64xf32>
    %210 = arith.mulf %209, %79 : vector<8x64xf32>
    %211 = arith.addf %206, %210 : vector<8x64xf32>
    %cst_74 = arith.constant 0.000000e+00 : f32
    %212 = vector.broadcast %cst_74 : f32 to vector<8x64xf32>
    %213 = arith.subf %212, %32 : vector<8x64xf32>
    %214 = math.exp %213 : vector<8x64xf32>
    %cst_75 = arith.constant 1.000000e+00 : f32
    %215 = vector.broadcast %cst_75 : f32 to vector<8x64xf32>
    %216 = arith.addf %215, %214 : vector<8x64xf32>
    %cst_76 = arith.constant 1.000000e+00 : f32
    %217 = vector.broadcast %cst_76 : f32 to vector<8x64xf32>
    %218 = arith.divf %217, %216 : vector<8x64xf32>
    %219 = arith.mulf %32, %218 : vector<8x64xf32>
    %220 = arith.mulf %211, %219 : vector<8x64xf32>
    %c0_77 = arith.constant 0 : index
    %c0_78 = arith.constant 0 : index
    %c0_79 = arith.constant 0 : index
    %221 = vector.load %arg13[%c0_77, %c0_78, %c0_79] : memref<1x64x32xf32, #tpu.memory_space<vmem>>, vector<1x64x32xf32>
    %222 = vector.shape_cast %221 : vector<1x64x32xf32> to vector<64x32xf32>
    %cst_80 = arith.constant dense<0.000000e+00> : vector<8x32xf32>
    %223 = tpu.matmul %220, %222, %cst_80 {dimension_numbers = #tpu.dot_dimension_numbers<[1], [0], [0], [1], [0, 0, 1, 1], [], []>} : vector<8x64xf32>, vector<64x32xf32>, vector<8x32xf32> -> vector<8x32xf32>
    %224 = arith.addf %3, %223 : vector<8x32xf32>
    %c0_81 = arith.constant 0 : index
    %c0_82 = arith.constant 0 : index
    %c0_83 = arith.constant 0 : index
    %225 = vector.load %arg14[%c0_81, %c0_82, %c0_83] : memref<1x1x32xf32, #tpu.memory_space<vmem>>, vector<1x1x32xf32>
    %226 = vector.shape_cast %225 : vector<1x1x32xf32> to vector<1x32xf32>
    %c0_84 = arith.constant 0 : index
    %c0_85 = arith.constant 0 : index
    %c0_86 = arith.constant 0 : index
    %227 = vector.load %arg15[%c0_84, %c0_85, %c0_86] : memref<1x1x32xf32, #tpu.memory_space<vmem>>, vector<1x1x32xf32>
    %228 = vector.shape_cast %227 : vector<1x1x32xf32> to vector<1x32xf32>
    %cst_87 = arith.constant dense<0.000000e+00> : vector<8xf32>
    %229 = vector.multi_reduction <add>, %224, %cst_87 [1] : vector<8x32xf32> to vector<8xf32>
    %230 = vector.shape_cast %229 : vector<8xf32> to vector<8x1xf32>
    %cst_88 = arith.constant 3.200000e+01 : f32
    %231 = vector.broadcast %cst_88 : f32 to vector<8x1xf32>
    %232 = arith.divf %230, %231 : vector<8x1xf32>
    %233 = vector.broadcast %232 : vector<8x1xf32> to vector<8x32xf32>
    %234 = arith.subf %224, %233 : vector<8x32xf32>
    %235 = arith.mulf %234, %234 : vector<8x32xf32>
    %cst_89 = arith.constant dense<0.000000e+00> : vector<8xf32>
    %236 = vector.multi_reduction <add>, %235, %cst_89 [1] : vector<8x32xf32> to vector<8xf32>
    %237 = vector.shape_cast %236 : vector<8xf32> to vector<8x1xf32>
    %cst_90 = arith.constant 3.200000e+01 : f32
    %238 = vector.broadcast %cst_90 : f32 to vector<8x1xf32>
    %239 = arith.divf %237, %238 : vector<8x1xf32>
    %cst_91 = arith.constant 9.99999974E-6 : f32
    %240 = vector.broadcast %cst_91 : f32 to vector<8x1xf32>
    %241 = arith.addf %239, %240 : vector<8x1xf32>
    %242 = math.rsqrt %241 : vector<8x1xf32>
    %243 = vector.broadcast %242 : vector<8x1xf32> to vector<8x32xf32>
    %244 = arith.mulf %234, %243 : vector<8x32xf32>
    %245 = vector.broadcast %226 : vector<1x32xf32> to vector<8x32xf32>
    %246 = arith.mulf %244, %245 : vector<8x32xf32>
    %247 = vector.broadcast %228 : vector<1x32xf32> to vector<8x32xf32>
    %248 = arith.addf %246, %247 : vector<8x32xf32>
    %c0_92 = arith.constant 0 : index
    %c0_93 = arith.constant 0 : index
    %c0_94 = arith.constant 0 : index
    %249 = vector.load %arg16[%c0_92, %c0_93, %c0_94] : memref<1x32x128xf32, #tpu.memory_space<vmem>>, vector<1x32x128xf32>
    %250 = vector.shape_cast %249 : vector<1x32x128xf32> to vector<32x128xf32>
    %cst_95 = arith.constant dense<0.000000e+00> : vector<8x128xf32>
    %251 = tpu.matmul %248, %250, %cst_95 {dimension_numbers = #tpu.dot_dimension_numbers<[1], [0], [0], [1], [0, 0, 1, 1], [], []>} : vector<8x32xf32>, vector<32x128xf32>, vector<8x128xf32> -> vector<8x128xf32>
    %c0_96 = arith.constant 0 : index
    %c0_97 = arith.constant 0 : index
    %c0_98 = arith.constant 0 : index
    %252 = vector.load %arg17[%c0_96, %c0_97, %c0_98] : memref<1x1x128xf32, #tpu.memory_space<vmem>>, vector<1x1x128xf32>
    %253 = vector.shape_cast %252 : vector<1x1x128xf32> to vector<1x128xf32>
    %254 = vector.broadcast %253 : vector<1x128xf32> to vector<8x128xf32>
    %255 = arith.addf %251, %254 : vector<8x128xf32>
    %cst_99 = arith.constant 5.000000e-01 : f32
    %256 = vector.broadcast %cst_99 : f32 to vector<8x128xf32>
    %257 = arith.mulf %256, %255 : vector<8x128xf32>
    %cst_100 = arith.constant 0.707106769 : f32
    %258 = vector.broadcast %cst_100 : f32 to vector<8x128xf32>
    %259 = arith.mulf %255, %258 : vector<8x128xf32>
    %cst_101 = arith.constant 0.000000e+00 : f32
    %260 = vector.broadcast %cst_101 : f32 to vector<8x128xf32>
    %261 = arith.cmpf oge, %259, %260 : vector<8x128xf32>
    %cst_102 = arith.constant 1.000000e+00 : f32
    %cst_103 = arith.constant -1.000000e+00 : f32
    %262 = vector.broadcast %cst_102 : f32 to vector<8x128xf32>
    %263 = vector.broadcast %cst_103 : f32 to vector<8x128xf32>
    %264 = arith.select %261, %262, %263 : vector<8x128xi1>, vector<8x128xf32>
    %265 = math.absf %259 : vector<8x128xf32>
    %cst_104 = arith.constant 0.327591091 : f32
    %266 = vector.broadcast %cst_104 : f32 to vector<8x128xf32>
    %267 = arith.mulf %266, %265 : vector<8x128xf32>
    %cst_105 = arith.constant 1.000000e+00 : f32
    %268 = vector.broadcast %cst_105 : f32 to vector<8x128xf32>
    %269 = arith.addf %268, %267 : vector<8x128xf32>
    %cst_106 = arith.constant 1.000000e+00 : f32
    %270 = vector.broadcast %cst_106 : f32 to vector<8x128xf32>
    %271 = arith.divf %270, %269 : vector<8x128xf32>
    %cst_107 = arith.constant 1.06140542 : f32
    %272 = vector.broadcast %cst_107 : f32 to vector<8x128xf32>
    %273 = arith.mulf %272, %271 : vector<8x128xf32>
    %cst_108 = arith.constant -1.45315206 : f32
    %274 = vector.broadcast %cst_108 : f32 to vector<8x128xf32>
    %275 = arith.addf %273, %274 : vector<8x128xf32>
    %276 = arith.mulf %275, %271 : vector<8x128xf32>
    %cst_109 = arith.constant 1.42141378 : f32
    %277 = vector.broadcast %cst_109 : f32 to vector<8x128xf32>
    %278 = arith.addf %276, %277 : vector<8x128xf32>
    %279 = arith.mulf %278, %271 : vector<8x128xf32>
    %cst_110 = arith.constant -0.284496725 : f32
    %280 = vector.broadcast %cst_110 : f32 to vector<8x128xf32>
    %281 = arith.addf %279, %280 : vector<8x128xf32>
    %282 = arith.mulf %281, %271 : vector<8x128xf32>
    %cst_111 = arith.constant 0.254829586 : f32
    %283 = vector.broadcast %cst_111 : f32 to vector<8x128xf32>
    %284 = arith.addf %282, %283 : vector<8x128xf32>
    %285 = arith.mulf %284, %271 : vector<8x128xf32>
    %cst_112 = arith.constant 0.000000e+00 : f32
    %286 = vector.broadcast %cst_112 : f32 to vector<8x128xf32>
    %287 = arith.subf %286, %265 : vector<8x128xf32>
    %288 = arith.mulf %287, %265 : vector<8x128xf32>
    %289 = math.exp %288 : vector<8x128xf32>
    %290 = arith.mulf %285, %289 : vector<8x128xf32>
    %cst_113 = arith.constant 1.000000e+00 : f32
    %291 = vector.broadcast %cst_113 : f32 to vector<8x128xf32>
    %292 = arith.subf %291, %290 : vector<8x128xf32>
    %293 = arith.mulf %264, %292 : vector<8x128xf32>
    %cst_114 = arith.constant 1.000000e+00 : f32
    %294 = vector.broadcast %cst_114 : f32 to vector<8x128xf32>
    %295 = arith.addf %294, %293 : vector<8x128xf32>
    %296 = arith.mulf %257, %295 : vector<8x128xf32>
    %c0_115 = arith.constant 0 : index
    %c0_116 = arith.constant 0 : index
    %c0_117 = arith.constant 0 : index
    %297 = vector.load %arg18[%c0_115, %c0_116, %c0_117] : memref<1x128x32xf32, #tpu.memory_space<vmem>>, vector<1x128x32xf32>
    %298 = vector.shape_cast %297 : vector<1x128x32xf32> to vector<128x32xf32>
    %cst_118 = arith.constant dense<0.000000e+00> : vector<8x32xf32>
    %299 = tpu.matmul %296, %298, %cst_118 {dimension_numbers = #tpu.dot_dimension_numbers<[1], [0], [0], [1], [0, 0, 1, 1], [], []>} : vector<8x128xf32>, vector<128x32xf32>, vector<8x32xf32> -> vector<8x32xf32>
    %c0_119 = arith.constant 0 : index
    %c0_120 = arith.constant 0 : index
    %c0_121 = arith.constant 0 : index
    %300 = vector.load %arg19[%c0_119, %c0_120, %c0_121] : memref<1x1x32xf32, #tpu.memory_space<vmem>>, vector<1x1x32xf32>
    %301 = vector.shape_cast %300 : vector<1x1x32xf32> to vector<1x32xf32>
    %302 = vector.broadcast %301 : vector<1x32xf32> to vector<8x32xf32>
    %303 = arith.addf %299, %302 : vector<8x32xf32>
    %304 = arith.addf %224, %303 : vector<8x32xf32>
    %c0_122 = arith.constant 0 : index
    %c0_123 = arith.constant 0 : index
    %305 = vector.load %arg24[%c0_122, %c0_123] : memref<8x32xf32, #tpu.memory_space<vmem>>, vector<8x32xf32>
    tpu.vector_store %arg24[%c0_122, %c0_123], %304 {strides = array<i32>} : memref<8x32xf32, #tpu.memory_space<vmem>>, vector<8x32xf32>,
    %c1_i32_124 = arith.constant 1 : i32
    %306 = arith.cmpi eq, %arg1, %c1_i32_124 : i32
    %307 = arith.extui %306 : i1 to i32
    %c0_i32_125 = arith.constant 0 : i32
    %308 = arith.cmpi ne, %307, %c0_i32_125 : i32
    scf.if %308 {
      %309 = vector.extract_strided_slice %304 {offsets = [7, 0], sizes = [1, 32], strides = [1, 1]} : vector<8x32xf32> to vector<1x32xf32>
      %c0_126 = arith.constant 0 : index
      %c0_127 = arith.constant 0 : index
      %310 = vector.load %arg20[%c0_126, %c0_127] : memref<1x32xf32, #tpu.memory_space<vmem>>, vector<1x32xf32>
      %c0_128 = arith.constant 0 : index
      %c0_129 = arith.constant 0 : index
      %311 = vector.load %arg21[%c0_128, %c0_129] : memref<1x32xf32, #tpu.memory_space<vmem>>, vector<1x32xf32>
      %cst_130 = arith.constant dense<0.000000e+00> : vector<1xf32>
      %312 = vector.multi_reduction <add>, %309, %cst_130 [1] : vector<1x32xf32> to vector<1xf32>
      %313 = vector.shape_cast %312 : vector<1xf32> to vector<1x1xf32>
      %cst_131 = arith.constant 3.200000e+01 : f32
      %314 = vector.broadcast %cst_131 : f32 to vector<1x1xf32>
      %315 = arith.divf %313, %314 : vector<1x1xf32>
      %316 = vector.broadcast %315 : vector<1x1xf32> to vector<1x32xf32>
      %317 = arith.subf %309, %316 : vector<1x32xf32>
      %318 = arith.mulf %317, %317 : vector<1x32xf32>
      %cst_132 = arith.constant dense<0.000000e+00> : vector<1xf32>
      %319 = vector.multi_reduction <add>, %318, %cst_132 [1] : vector<1x32xf32> to vector<1xf32>
      %320 = vector.shape_cast %319 : vector<1xf32> to vector<1x1xf32>
      %cst_133 = arith.constant 3.200000e+01 : f32
      %321 = vector.broadcast %cst_133 : f32 to vector<1x1xf32>
      %322 = arith.divf %320, %321 : vector<1x1xf32>
      %cst_134 = arith.constant 9.99999974E-6 : f32
      %323 = vector.broadcast %cst_134 : f32 to vector<1x1xf32>
      %324 = arith.addf %322, %323 : vector<1x1xf32>
      %325 = math.rsqrt %324 : vector<1x1xf32>
      %326 = vector.broadcast %325 : vector<1x1xf32> to vector<1x32xf32>
      %327 = arith.mulf %317, %326 : vector<1x32xf32>
      %328 = arith.mulf %327, %310 : vector<1x32xf32>
      %329 = arith.addf %328, %311 : vector<1x32xf32>
      %c0_135 = arith.constant 0 : index
      %c0_136 = arith.constant 0 : index
      %330 = vector.load %arg22[%c0_135, %c0_136] : memref<32x5xf32, #tpu.memory_space<vmem>>, vector<32x5xf32>
      %cst_137 = arith.constant dense<0.000000e+00> : vector<1x5xf32>
      %331 = tpu.matmul %329, %330, %cst_137 {dimension_numbers = #tpu.dot_dimension_numbers<[1], [0], [0], [1], [0, 0, 1, 1], [], []>} : vector<1x32xf32>, vector<32x5xf32>, vector<1x5xf32> -> vector<1x5xf32>
      %c0_138 = arith.constant 0 : index
      %c0_139 = arith.constant 0 : index
      %c0_140 = arith.constant 0 : index
      %332 = vector.load %arg23[%c0_138, %c0_139, %c0_140] : memref<1x1x5xf32, #tpu.memory_space<vmem>>, vector<1x1x5xf32>
      %333 = vector.shape_cast %332 : vector<1x1x5xf32> to vector<1x5xf32>
      %334 = vector.shape_cast %331 : vector<1x5xf32> to vector<1x1x5xf32>
      tpu.vector_store %arg23[%c0_138, %c0_139, %c0_140], %334 {strides = array<i32>} : memref<1x1x5xf32, #tpu.memory_space<vmem>>, vector<1x1x5xf32>,
    } else {
    }
    return
  }
  func.func @transform_0(%arg0: i32, %arg1: i32) -> (i32, i32, i32) {
    %c0_i32 = arith.constant 0 : i32
    %c0_i32_0 = arith.constant 0 : i32
    %c0_i32_1 = arith.constant 0 : i32
    return %arg0, %c0_i32, %c0_i32_0 : i32, i32, i32
  }
  func.func @transform_1(%arg0: i32, %arg1: i32) -> (i32, i32, i32) {
    %c0_i32 = arith.constant 0 : i32
    %c0_i32_0 = arith.constant 0 : i32
    %c0_i32_1 = arith.constant 0 : i32
    return %arg1, %c0_i32, %c0_i32_0 : i32, i32, i32
  }
  func.func @transform_2(%arg0: i32, %arg1: i32) -> (i32, i32, i32) {
    %c0_i32 = arith.constant 0 : i32
    %c0_i32_0 = arith.constant 0 : i32
    %c0_i32_1 = arith.constant 0 : i32
    return %arg1, %c0_i32, %c0_i32_0 : i32, i32, i32
  }
  func.func @transform_3(%arg0: i32, %arg1: i32) -> (i32, i32, i32) {
    %c0_i32 = arith.constant 0 : i32
    %c0_i32_0 = arith.constant 0 : i32
    %c0_i32_1 = arith.constant 0 : i32
    return %arg1, %c0_i32, %c0_i32_0 : i32, i32, i32
  }
  func.func @transform_4(%arg0: i32, %arg1: i32) -> (i32, i32, i32) {
    %c0_i32 = arith.constant 0 : i32
    %c0_i32_0 = arith.constant 0 : i32
    %c0_i32_1 = arith.constant 0 : i32
    return %arg1, %c0_i32, %c0_i32_0 : i32, i32, i32
  }
  func.func @transform_5(%arg0: i32, %arg1: i32) -> (i32, i32, i32) {
    %c0_i32 = arith.constant 0 : i32
    %c0_i32_0 = arith.constant 0 : i32
    %c0_i32_1 = arith.constant 0 : i32
    return %arg1, %c0_i32, %c0_i32_0 : i32, i32, i32
  }
  func.func @transform_6(%arg0: i32, %arg1: i32) -> (i32, i32, i32) {
    %c0_i32 = arith.constant 0 : i32
    %c0_i32_0 = arith.constant 0 : i32
    %c0_i32_1 = arith.constant 0 : i32
    return %arg1, %c0_i32, %c0_i32_0 : i32, i32, i32
  }
  func.func @transform_7(%arg0: i32, %arg1: i32) -> (i32, i32, i32) {
    %c0_i32 = arith.constant 0 : i32
    %c0_i32_0 = arith.constant 0 : i32
    %c0_i32_1 = arith.constant 0 : i32
    return %arg1, %c0_i32, %c0_i32_0 : i32, i32, i32
  }
  func.func @transform_8(%arg0: i32, %arg1: i32) -> (i32, i32, i32) {
    %c0_i32 = arith.constant 0 : i32
    %c0_i32_0 = arith.constant 0 : i32
    %c0_i32_1 = arith.constant 0 : i32
    return %arg1, %c0_i32, %c0_i32_0 : i32, i32, i32
  }
  func.func @transform_9(%arg0: i32, %arg1: i32) -> (i32, i32, i32) {
    %c0_i32 = arith.constant 0 : i32
    %c0_i32_0 = arith.constant 0 : i32
    %c0_i32_1 = arith.constant 0 : i32
    return %arg1, %c0_i32, %c0_i32_0 : i32, i32, i32
  }
  func.func @transform_10(%arg0: i32, %arg1: i32) -> (i32, i32, i32) {
    %c0_i32 = arith.constant 0 : i32
    %c0_i32_0 = arith.constant 0 : i32
    %c0_i32_1 = arith.constant 0 : i32
    return %arg1, %c0_i32, %c0_i32_0 : i32, i32, i32
  }
  func.func @transform_11(%arg0: i32, %arg1: i32) -> (i32, i32, i32) {
    %c0_i32 = arith.constant 0 : i32
    %c0_i32_0 = arith.constant 0 : i32
    %c0_i32_1 = arith.constant 0 : i32
    return %arg1, %c0_i32, %c0_i32_0 : i32, i32, i32
  }
  func.func @transform_12(%arg0: i32, %arg1: i32) -> (i32, i32, i32) {
    %c0_i32 = arith.constant 0 : i32
    %c0_i32_0 = arith.constant 0 : i32
    %c0_i32_1 = arith.constant 0 : i32
    return %arg1, %c0_i32, %c0_i32_0 : i32, i32, i32
  }
  func.func @transform_13(%arg0: i32, %arg1: i32) -> (i32, i32, i32) {
    %c0_i32 = arith.constant 0 : i32
    %c0_i32_0 = arith.constant 0 : i32
    %c0_i32_1 = arith.constant 0 : i32
    return %arg1, %c0_i32, %c0_i32_0 : i32, i32, i32
  }
  func.func @transform_14(%arg0: i32, %arg1: i32) -> (i32, i32, i32) {
    %c0_i32 = arith.constant 0 : i32
    %c0_i32_0 = arith.constant 0 : i32
    %c0_i32_1 = arith.constant 0 : i32
    return %arg1, %c0_i32, %c0_i32_0 : i32, i32, i32
  }
  func.func @transform_15(%arg0: i32, %arg1: i32) -> (i32, i32, i32) {
    %c0_i32 = arith.constant 0 : i32
    %c0_i32_0 = arith.constant 0 : i32
    %c0_i32_1 = arith.constant 0 : i32
    return %arg1, %c0_i32, %c0_i32_0 : i32, i32, i32
  }
  func.func @transform_16(%arg0: i32, %arg1: i32) -> (i32, i32, i32) {
    %c0_i32 = arith.constant 0 : i32
    %c0_i32_0 = arith.constant 0 : i32
    %c0_i32_1 = arith.constant 0 : i32
    return %arg1, %c0_i32, %c0_i32_0 : i32, i32, i32
  }
  func.func @transform_17(%arg0: i32, %arg1: i32) -> (i32, i32, i32) {
    %c0_i32 = arith.constant 0 : i32
    %c0_i32_0 = arith.constant 0 : i32
    %c0_i32_1 = arith.constant 0 : i32
    return %arg1, %c0_i32, %c0_i32_0 : i32, i32, i32
  }
  func.func @transform_18(%arg0: i32, %arg1: i32) -> (i32, i32) {
    %c0_i32 = arith.constant 0 : i32
    %c0_i32_0 = arith.constant 0 : i32
    %c0_i32_1 = arith.constant 0 : i32
    return %c0_i32, %c0_i32_0 : i32, i32
  }
  func.func @transform_19(%arg0: i32, %arg1: i32) -> (i32, i32) {
    %c0_i32 = arith.constant 0 : i32
    %c0_i32_0 = arith.constant 0 : i32
    %c0_i32_1 = arith.constant 0 : i32
    return %c0_i32, %c0_i32_0 : i32, i32
  }
  func.func @transform_20(%arg0: i32, %arg1: i32) -> (i32, i32) {
    %c0_i32 = arith.constant 0 : i32
    %c0_i32_0 = arith.constant 0 : i32
    %c0_i32_1 = arith.constant 0 : i32
    return %c0_i32, %c0_i32_0 : i32, i32
  }
  func.func @transform_21(%arg0: i32, %arg1: i32) -> (i32, i32, i32) {
    %c0_i32 = arith.constant 0 : i32
    %c0_i32_0 = arith.constant 0 : i32
    %c0_i32_1 = arith.constant 0 : i32
    return %arg0, %c0_i32, %c0_i32_0 : i32, i32, i32
  }
}

</mosaic_0001>

<bundles_post_ra>
// kernel: mamba_forward.1
= control target key start
LH: loop header
LB: loop body
LE: loop exit
PB: predicated region body
PF: predicated region fallthrough
CT: control target
= control target key end

     0   :  { %s3803_s0 = inlined_call_operand.vmem [shape: f32[2,8,32], index: 0, kind: input, shape index: {}]   ;;  %s3804_s1 = inlined_call_operand.vmem [shape: f32[2,1,32], index: 1, kind: input, shape index: {}]   ;;  %s3805_s2 = inlined_call_operand.vmem [shape: f32[2,1,32], index: 2, kind: input, shape index: {}]   ;;  %s3806_s3 = inlined_call_operand.vmem [shape: f32[2,32,128], index: 3, kind: input, shape index: {}]   ;;  %s3807_s4 = inlined_call_operand.vmem [shape: f32[2,4,64], index: 4, kind: input, shape index: {}]   ;;  %s3808_s5 = inlined_call_operand.vmem [shape: f32[2,1,64], index: 5, kind: input, shape index: {}]   ;;  %s3809_s6 = inlined_call_operand.vmem [shape: f32[2,64,34], index: 6, kind: input, shape index: {}]   ;;  %s3810_s7 = inlined_call_operand.vmem [shape: f32[2,2,64], index: 7, kind: input, shape index: {}]   ;;  %s3811_s8 = inlined_call_operand.vmem [shape: f32[2,1,64], index: 8, kind: input, shape index: {}]   ;;  %s3812_s9 = inlined_call_operand.vmem [shape: f32[2,16,64], index: 9, kind: input, shape index: {}]   ;;  %s3813_s10 = inlined_call_operand.vmem [shape: f32[2,1,64], index: 10, kind: input, shape index: {}]   ;;  %s3814_s11 = inlined_call_operand.vmem [shape: f32[2,64,32], index: 11, kind: input, shape index: {}]   ;;  %s3815_s12 = inlined_call_operand.vmem [shape: f32[2,1,32], index: 12, kind: input, shape index: {}]   ;;  %s3816_s13 = inlined_call_operand.vmem [shape: f32[2,1,32], index: 13, kind: input, shape index: {}]   ;;  %s3817_s14 = inlined_call_operand.vmem [shape: f32[2,32,128], index: 14, kind: input, shape index: {}]   ;;  %s3818_s15 = inlined_call_operand.vmem [shape: f32[2,1,128], index: 15, kind: input, shape index: {}]   ;;  %s3819_s16 = inlined_call_operand.vmem [shape: f32[2,128,32], index: 16, kind: input, shape index: {}]   ;;  %s3820_s17 = inlined_call_operand.vmem [shape: f32[2,1,32], index: 17, kind: input, shape index: {}]   ;;  %s3821_s18 = inlined_call_operand.vmem [shape: f32[1,32], index: 18, kind: input, shape index: {}]   ;;  %s3822_s19 = inlined_call_operand.vmem [shape: f32[1,32], index: 19, kind: input, shape index: {}]   ;;  %s3823_s20 = inlined_call_operand.vmem [shape: f32[32,5], index: 20, kind: input, shape index: {}]   ;;  %s3824_s21 = inlined_call_operand.hbm [shape: f32[2,1,5], index: 21, kind: output, shape index: {}]  }
   0x1   :  { %3840 = sst [smem:[#allocation21_spill]] %s3803_s0 }
   0x2   :  { %3841 = sst [smem:[#allocation22_spill]] %s3804_s1 }
   0x3   :  { %3842 = sst [smem:[#allocation23_spill]] %s3805_s2 }
   0x4   :  { %3843 = sst [smem:[#allocation24_spill]] %s3806_s3 }
   0x5   :  { %3844 = sst [smem:[#allocation25_spill]] %s3807_s4 }
   0x6   :  { %3845 = sst [smem:[#allocation26_spill]] %s3808_s5 }
   0x7   :  { %3846 = sst [smem:[#allocation27_spill]] %s3809_s6 }
   0x8   :  { %3847 = sst [smem:[#allocation28_spill]] %s3810_s7 }
   0x9   :  { %3848 = sst [smem:[#allocation29_spill]] %s3812_s9 }
   0xa   :  { %3849 = sst [smem:[#allocation30_spill]] %s3814_s11 }
   0xb   :  { %3850 = sst [smem:[#allocation31_spill]] %s3819_s16 }
   0xc   :  { %3851 = sst [smem:[#allocation32_spill]] %s3820_s17 }
   0xd   :  { %3852 = sst [smem:[#allocation33_spill]] %s3821_s18 }
   0xe   :  { %3853 = sst [smem:[#allocation34_spill]] %s3822_s19 }
   0xf   :  { %3854 = sst [smem:[#allocation35_spill]] %s3823_s20 }
  0x10   :  { %3855 = sst [smem:[#allocation36_spill]] %s3824_s21 }
  0x11   :  { %26 = vsyncpa [#allocation5], 0 }
  0x12   :  { %28 = vsyncpa [#allocation5 + $0x1], 0  ;;  %s3210_s2 = smov 0   ;;  %s3212_s25 = smov 0  }
  0x13   :  { %s3214_s26 = smov 0   ;;  %s3216_s27 = smov 0  }
  0x14   :  { %s3218_s3 = smov 0   ;;  %s3220_s28 = smov 0  }
  0x15   :  { %s3222_s29 = smov 0   ;;  %s3224_s0 = smov 0  }
  0x16 LB: > { %3856 = sst [smem:[#allocation7_spill]] %s3058_s2  ;;  %s2583_s4 = sadd.s32 4294967295, %s3086_s0   ;;  %s3086_s0 = sphi %s3224_s0, %s34_s0   ;;  %s3082_s29 = sphi %s3222_s29, %s3916_s29   ;;  %s3078_s28 = sphi %s3220_s28, %s3915_s28   ;;  %s3074_s3 = sphi %s3218_s3, %s3914_s3   ;;  %s3070_s27 = sphi %s3216_s27, %s3913_s27   ;;  %s3066_s26 = sphi %s3214_s26, %s3912_s26   ;;  %s3062_s25 = sphi %s3212_s25, %s3918_s25   ;;  %s3058_s2 = sphi %s3210_s2, %s3917_s2  }
  0x17   : > { %3857 = sst [smem:[#allocation8_spill]] %s3066_s26  ;;  %s2584_s30 = sadd.s32 4294967294, %s3086_s0  }
  0x18   : > { %3858 = sst [smem:[#allocation9_spill]] %s3070_s27  ;;  %s43_s5 = sadd.s32 1, %s3078_s28 }
  0x19   : > { %3859 = sst [smem:[#allocation10_spill]] %s3074_s3  ;;  %p44_p0 = scmp.ge.s32.totalorder %s43_s5, 2 }
  0x1a   : > { %3860 = sst [smem:[#allocation11_spill]] %s3078_s28  ;;  %s46_s22 = sadd.s32 1, %s3082_s29 }
  0x1b   : > { %3861 = sst [smem:[#allocation12_spill]] %s3082_s29  ;;  %p594_p1 = scmp.ne.s32.totalorder %s3066_s26, %s3062_s25 }
  0x1c   : > { %3862 = sst [smem:[#allocation13_spill]] %s3086_s0  ;;  %p595_p2 = scmp.eq.s32.totalorder %s2583_s4, 3 }
  0x1d   : > { %s3920_s5 = smov (%p44_p0, %s43_s5), 0  ;;  %s3922_s22 = smov (!%p44_p0, %s46_s22), %s3082_s29 }
  0x1e   : > { %3863 = sst [smem:[#allocation14_spill]] %s3920_s5  ;;  %p3259_p3 = por %p595_p2, %p594_p1 }
  0x1f   : > { %p600_p4 = scmp.ne.s32.totalorder %s3062_s25, %s3058_s2  ;;  %p48_p5 = scmp.ge.s32.totalorder %s3922_s22, 2 }
  0x20   : > { %s3864_s23 = scalar_select %p3259_p3, 1, 0 }
  0x21   : > { %p601_p6 = scmp.eq.s32.totalorder %s2584_s30, 3  ;;  %p2587_p7 = scmp.ge.s32.totalorder %s3086_s0, 1 }
  0x22   : > { %3865 = sst [smem:[#allocation15_spill]] %s3864_s23  ;;  %p751_p8 = scmp.lt.s32.totalorder %s3086_s0, 5 }
  0x23   : > { %s3924_s22 = smov (%p48_p5, %s3922_s22), 0  ;;  %p3269_p9 = por %p601_p6, %p600_p4 }
  0x24   : > { %3866 = sst [smem:[#allocation16_spill]] %s3924_s22  ;;  %p752_p10 = pnand %p2587_p7, %p751_p8 }
  0x25   : > { %s3867_s1 = scalar_select %p3269_p9, 1, 0 }
  0x26   : > { %s581_s24 = ssub.s32 %s3082_s29, %s3924_s22  ;;  %s584_s4 = sadd.s32 1, %s3066_s26 }
  0x27   : > { %3868 = sst [smem:[#allocation17_spill]] %s3867_s1  ;;  %p582_p11 = scmp.eq.s32.totalorder %s581_s24, 0 }
  0x28   : > { %755 = sbr.rel (%p752_p10) target bundleno = 2672 (0xa70), region = 104 }
  0x29   : > { %s3277_s5 = scalar_select %p582_p11, %s3066_s26, %s584_s4  }
  0x2b   : > { %3869 = sst [smem:[#allocation18_spill]] %s3277_s5 }
  0x2f   : > { %p874_p12 = scmp.lt.s32.totalorder %s3074_s3, 1  ;;  %p878_p13 = scmp.lt.s32.totalorder %s3070_s27, 1 }
  0x30   : > { %s3870_s29 = sld [smem:[#allocation21_spill]]  ;;  %s3873_s17 = sld [smem:[#allocation24_spill]] }
  0x31   : > { %s875_s28 = scalar_select %p874_p12, %s3074_s3, 1 }
  0x32   : > { %s3284_s2 = scalar_select %p878_p13, %s3070_s27, 1 }
  0x33   : > { %s2588_s24 = sshll.u32 %s875_s28, 3  ;;  %s3878_s6 = sld [smem:[#allocation27_spill]] }
  0x34   : > { %s2624_s18 = sshll.u32 %s3284_s2, 5  ;;  %s2591_s22 = sshll.u32 %s3284_s2, 2 }
  0x35   : > { %s2625_s3 = sshll.u32 %s3284_s2, 6  ;;  %s2594_s19 = sshll.u32 %s3284_s2, 1 }
  0x36   : > { %s877_s30 = scalar_lea.vmem %s3870_s29, %s2588_s24  ;;  %s3301_s28 = scalar_lea.vmem %s3873_s17, %s2624_s18 }
  0x37   : > { %3874 = sst [smem:[#allocation19_spill]] %s3301_s28  ;;  %s3879_s7 = sld [smem:[#allocation28_spill]] }
  0x38   : > { %s3875_s24 = sld [smem:[#allocation25_spill]]  ;;  %s2626_s5 = sshll.u32 %s3284_s2, 4 }
  0x39   : > { %s3318_s17 = scalar_lea.vmem %s3878_s6, %s2625_s3  ;;  %s3880_s9 = sld [smem:[#allocation29_spill]] }
  0x3a   : > { %s3881_s11 = sld [smem:[#allocation30_spill]]  ;;  %s3355_s21 = scalar_lea.vmem %s3817_s14, %s2624_s18 }
  0x3b   : > { %s934_s0 = scalar_lea.vmem %s3818_s15, %s3284_s2  ;;  %s2629_s6 = sshll.u32 %s3284_s2, 7 }
  0x3c   : > { %s3884_s29 = sand.u32 1, %s3062_s25   ;;  %s3885_s1 = sld [smem:[#allocation9_spill]] }
  0x3d   : > { %s3323_s4 = scalar_lea.vmem %s3879_s7, %s2594_s19  ;;  %s3373_s7 = scalar_lea.vmem [#allocation4], %s3884_s29 }
  0x3e   : > { %s3307_s26 = scalar_lea.vmem %s3875_s24, %s2591_s22  ;;  %s3883_s22 = sld [smem:[#allocation32_spill]] }
  0x3f   : > { %3876 = sst [smem:[#allocation20_spill]] %s3307_s26  ;;  %s3333_s23 = scalar_lea.vmem %s3880_s9, %s2626_s5 }
  0x40   : > { %s3342_s28 = scalar_lea.vmem %s3881_s11, %s2625_s3  ;;  %s3882_s9 = sld [smem:[#allocation31_spill]] }
  0x42   : > { %p2603_p0 = scmp.ne.s32.totalorder %s3885_s1, 0 }
  0x43   : > { %v947_v0 = vld [vmem:[%s877_s30] sm:$0xff] (!%p2603_p0)  ;;  %vm948_vm0 = vcmask (!%p2603_p0), 261120  }
  0x44   : > { %s942_s24 = scalar_lea.vmem %s3883_s22, %s3284_s2  ;;  %946 = sbr.rel (%p2603_p0) target bundleno = 75 (0x4b), region = 108  ;;  %949 = vst.msk [vmem:[#allocation2] sm:$0xff] (!%p2603_p0), %vm948_vm0, %v947_v0 }
  0x46   : > { %s3365_s11 = scalar_lea.vmem %s3882_s9, %s2629_s6 }
  0x4b PF: > { %v950_v1 = vld [vmem:[#allocation2] sm:$0xff]  ;;  %s3886_s18 = sld [smem:[#allocation19_spill]]  ;;  %vm953_vm1 = vcmask 261120   ;;  %v3088_v11 = vmov 0.0|0.0   ;;  %vm3089_vm2 = vmmov 0   ;;  %v3090_v14 = vmov 0.0   ;;  %s3894_s30 = scalar_lea.vmem %s3811_s8, %s3284_s2 }
  0x4c   : > { %v954_v2 = vsel %vm953_vm1, %v950_v1, 0.0  ;;  %2786 = vmatprep.subr.bf16.mxu0 %v3088_v11  ;;  %2688 = vmatprep.mubr.msk.f32.mxu0 %vm3089_vm2, %v3090_v14  ;;  %s3887_s22 = sld [smem:[#allocation22_spill]]  ;;  %s3889_s6 = sld [smem:[#allocation23_spill]]  ;;  %v1110_v25 = vld [vmem:[%s3318_s17] sm:$0xff]  ;;  %v1111_v26 = vld [vmem:[%s3318_s17 + $0x8] sm:$0xff]  ;;  %v1112_v28 = vld [vmem:[%s3318_s17 + $0x10] sm:$0xff]  ;;  %v1060_v38 = vlaneseq }
  0x4d   : > { %955 = vadd.xlane.f32.xlu0 %v954_v2  ;;  %2792 = vmatprep.subr.bf16.mxu1 %v3088_v11  ;;  %v2793_v27 = vpack.c.bf16 %v1111_v26, %v1110_v25  ;;  %v1113_v29 = vld [vmem:[%s3318_s17 + $0x18] sm:$0xff]  ;;  %v1114_v31 = vld [vmem:[%s3318_s17 + $0x20] sm:$0xff]  ;;  %v1115_v32 = vld [vmem:[%s3318_s17 + $0x28] sm:$0xff]  ;;  %s3891_s20 = sld [smem:[#allocation20_spill]]  ;;  %v3091_v37 = vmov 32   ;;  %vm1118_vm6 = vcmask 523264   ;;  %s3896_s16 = scalar_lea.vmem %s3815_s12, %s3284_s2 }
  0x4e   : > { %2707 = vmatprep.mubr.msk.f32.mxu1 %vm3089_vm2, %v3090_v14  ;;  %v2796_v30 = vpack.c.bf16 %v1113_v29, %v1112_v28  ;;  %v2799_v33 = vpack.c.bf16 %v1115_v32, %v1114_v31  ;;  %v1116_v34 = vld [vmem:[%s3318_s17 + $0x30] sm:$0xff]  ;;  %v1117_v35 = vld [vmem:[%s3318_s17 + $0x38] sm:$0xff]  ;;  %2934 = vset.pattern.permute.xlu1 %v3091_v37  ;;  %v3415_v39 = vshrl.u32 %v1060_v38, 7  ;;  %s3892_s27 = sld [smem:[#allocation26_spill]]  ;;  %s3093_s1 = smov 64   ;;  %vm1885_vm7 = vcmask 1041409  }
  0x4f   : > { %2794 = vmatpush3.bf16.msra.mxu1 %v2793_v27  ;;  %v2802_v36 = vpack.c.bf16 %v1117_v35, %v1116_v34  ;;  %v1192_v38 = vld [vmem:[%s3323_s4] sm:$0x3]  ;;  %vm1888_vm8 = vcmask 1042434   ;;  %vm1891_vm9 = vcmask 1043459   ;;  %vm1894_vm10 = vcmask 1044484   ;;  %s3899_s19 = sld [smem:[#allocation9_spill]] }
  0x50   : > { %2795 = vmatprep.subr.bf16.mxu1 %v3088_v11  ;;  %v3418_v40 = vsub.s32 0, %v3415_v39  ;;  %v3421_v41 = vsub.s32 1, %v3415_v39  ;;  %vm1071_vm3 = vcmp.ge.s32.totalorder %v3415_v39, 3  ;;  %vm1080_vm4 = vcmp.ge.s32.totalorder %v3415_v39, 2 }
  0x51   : > { %v982_v8 = vld [vmem:[%s3886_s18] sm:$0xff]  ;;  %v983_v9 = vld [vmem:[%s3886_s18 + $0x8] sm:$0xff]  ;;  %v984_v10 = vld [vmem:[%s3886_s18 + $0x10] sm:$0xff]  ;;  %v1093_v45 = vsub.s32 2, %v3415_v39  ;;  %vm1089_vm5 = vcmp.ge.s32.totalorder %v3415_v39, 1  ;;  %v1099_v51 = vsub.s32 3, %v3415_v39 }
  0x52   : > { %v2787_v12 = vpack.c.bf16 %v983_v9, %v982_v8  ;;  %v985_v13 = vld [vmem:[%s3886_s18 + $0x18] sm:$0xff]  ;;  %s3888_s5 = scalar_lea.vmem %s3887_s22, %s3284_s2  ;;  %s3890_s3 = scalar_lea.vmem %s3889_s6, %s3284_s2  ;;  %v3092_v8 = vmov 33   ;;  %vm1897_vm11 = vcmask 1045509   ;;  %vm1900_vm12 = vcmask 1046534  }
  0x53   : > { %v2790_v15 = vpack.c.bf16 %v985_v13, %v984_v10  ;;  %v2604_v20 = vld [vmem:[%s3888_s5] ss:$0 sm:$0xff]  ;;  %2797 = vmatpush3.bf16.msra.mxu1 %v2796_v30  ;;  %2936 = vset.pattern.permute.xlu0 %v3092_v8  ;;  %vm1903_vm13 = vcmask 1047559   ;;  %s3897_s6 = scalar_lea.vmem %s3816_s13, %s3284_s2 }
  0x54   : > { %2788 = vmatpush3.bf16.msra.mxu0 %v2787_v12  ;;  %v2605_v22 = vld [vmem:[%s3890_s3] ss:$0 sm:$0xff]  ;;  %2798 = vmatprep.subr.bf16.mxu1 %v3088_v11  ;;  %s3893_s29 = scalar_lea.vmem %s3892_s27, %s3284_s2 }
  0x55   : > { %2789 = vmatprep.subr.bf16.mxu0 %v3088_v11  ;;  %v1059_v42 = vld [vmem:[%s3891_s20] sm:$0xf]  ;;  %p2617_p1 = scmp.ne.s32.totalorder %s3899_s19, 1 }
  0x56   : > { %v1076_v44 = vrot.slane %v1059_v42, %v3418_v40  ;;  %v1085_v50 = vrot.slane %v1059_v42, %v3421_v41  ;;  %v2607_v54 = vld [vmem:[%s3893_s29] ss:$0 sm:$0xff]  ;;  %v1094_v56 = vrot.slane %v1059_v42, %v1093_v45  ;;  %v1100_v60 = vrot.slane %v1059_v42, %v1099_v51  ;;  %s3900_s27 = sld [smem:[#allocation35_spill]] (!%p2617_p1)  ;;  %s3902_s5 = sld [smem:[#allocation33_spill]] (!%p2617_p1) }
  0x57   : > { %2800 = vmatpush3.bf16.msra.mxu1 %v2799_v33  ;;  %v1209_v42 = vrot.slane %v1192_v38, %v3418_v40  ;;  %vm2219_vm15 = vcmask (!%p2617_p1), 261127   ;;  %vm3097_vm0 = vmmov (!%p2617_p1), 0   ;;  %s3903_s26 = sld [smem:[#allocation34_spill]] (!%p2617_p1) }
  0x58   : > { %2791 = vmatpush3.bf16.msra.mxu0 %v2790_v15  ;;  %2801 = vmatprep.subr.bf16.mxu1 %v3088_v11  ;;  %v1468_v15 = vsub.s32 4, %v3415_v39 }
  0x59   : > { %2822 = vmatprep.subr.bf16.mxu0 %v3088_v11 }
  0x5b   : > { %2803 = vmatpush3.bf16.msra.mxu1 %v2802_v36 }
  0x5c   : > { %2804 = vmatprep.subr.bf16.mxu1 %v3088_v11 }
  0xda   : > { %v956_v3 = vpop.xlane.xlu0 %955 }
  0xdb   : > { %v958_v4 = vmul.f32 0.03125, %v956_v3 }
  0xdd   : > { %v959_v5 = vsub.f32 %v950_v1, %v958_v4 }
  0xdf   : > { %v960_v6 = vmul.f32 %v959_v5, %v959_v5 }
  0xe1   : > { %v961_v7 = vsel %vm953_vm1, %v960_v6, 0.0 }
  0xe2   : > { %962 = vadd.xlane.f32.xlu0 %v961_v7 }
 0x16f   : > { %v963_v16 = vpop.xlane.xlu0 %962 }
 0x170   : > { %v964_v17 = vmul.f32 0.03125, %v963_v16 }
 0x172   : > { %v965_v18 = vadd.f32 1e-05, %v964_v17  ;;  %v1479_v17 = vsub.s32 5, %v3415_v39 }
 0x174   : > { %2937 = vrsqrt.f32 %v965_v18 }
 0x17e   : > { %v2938_v19 = vpop.eup %2937 }
 0x17f   : > { %v967_v21 = vmul.f32 %v2938_v19, %v959_v5 }
 0x181   : > { %v974_v23 = vmul.f32 %v2604_v20, %v967_v21  ;;  %v1490_v20 = vsub.s32 6, %v3415_v39 }
 0x183   : > { %v981_v24 = vadd.f32 %v2605_v22, %v974_v23  ;;  %v1501_v23 = vsub.s32 7, %v3415_v39 }
 0x185   : > { %2689 = vmatmul.mubr.msk.f32.vlgmr.msra.gmra.mrb[0].mxu0 %vm953_vm1, %v981_v24 }
 0x186   : > { %2772 = vmatprep.mubr.msk.f32.mxu0 %vm3089_vm2, %v3090_v14 }
 0x258   : > { %v3424_v43 = vpop.f32.mrb[0].mxu0 }
 0x259   : > { %v1070_v46 = vrot.slane %v3424_v43, 5  ;;  %v1079_v47 = vrot.slane %v3424_v43, 6  ;;  %v1088_v48 = vrot.slane %v3424_v43, 7  ;;  %v2690_v49 = vpop.f32.mrb[1].mxu0  ;;  %v1101_v0 = vmul.f32 %v1100_v60, %v3424_v43  ;;  %v1875_v60 = vld [vmem:[%s3342_s28 + $0x38] sm:$0xff] }
 0x25a   : > { %v1821_v21 = vsub.f32 0.0, %v3424_v43  ;;  %v1219_v49 = vrot.slane %v1192_v38, %v3421_v41 }
 0x25b   : > { %v1072_v52 = vsel %vm1071_vm3, %v1070_v46, 0.0  ;;  %v1081_v53 = vsel %vm1080_vm4, %v1079_v47, 0.0  ;;  %v1090_v57 = vsel %vm1089_vm5, %v1088_v48, 0.0  ;;  %v2609_v47 = vld [vmem:[%s3894_s30] ss:$0 sm:$0xff] }
 0x25c   : > { %v1077_v55 = vmul.f32 %v1076_v44, %v1072_v52  ;;  %v1086_v58 = vmul.f32 %v1085_v50, %v1081_v53  ;;  %v1095_v62 = vmul.f32 %v1094_v56, %v1090_v57  ;;  %v1822_v24 = vmul.f32 1.442695, %v1821_v21  ;;  %v1869_v44 = vld [vmem:[%s3342_s28 + $0x8] sm:$0xff]  ;;  %v1870_v50 = vld [vmem:[%s3342_s28 + $0x10] sm:$0xff]  ;;  %v1872_v52 = vld [vmem:[%s3342_s28 + $0x20] sm:$0xff] }
 0x25e   : > { %v1078_v59 = vadd.f32 %v2607_v54, %v1077_v55  ;;  %v1873_v54 = vld [vmem:[%s3342_s28 + $0x28] sm:$0xff] }
 0x260   : > { %v1087_v61 = vadd.f32 %v1086_v58, %v1078_v59  ;;  %v2811_v58 = vpack.c.bf16 %v1873_v54, %v1872_v52  ;;  %v1874_v59 = vld [vmem:[%s3342_s28 + $0x30] sm:$0xff] }
 0x262   : > { %v1096_v63 = vadd.f32 %v1095_v62, %v1087_v61 }
 0x264   : > { %v1102_v1 = vadd.f32 %v1101_v0, %v1096_v63  ;;  %v2814_v63 = vpack.c.bf16 %v1875_v60, %v1874_v59 }
 0x266   : > { %v1103_v2 = vsub.f32 0.0, %v1102_v1 }
 0x268   : > { %v1104_v3 = vmul.f32 1.442695, %v1103_v2 }
 0x26a   : > { %2939 = vpow2.f32 %v1104_v3 }
 0x274   : > { %v2940_v4 = vpop.eup %2939 }
 0x275   : > { %v1106_v5 = vadd.f32 1.0, %v2940_v4 }
 0x277   : > { %2941 = vrcp.f32 %v1106_v5 }
 0x278   : > { %2943 = vpow2.f32 %v1822_v24 }
 0x281   : > { %v2942_v6 = vpop.eup %2941 }
 0x282   : > { %v3442_v7 = vmul.f32 %v2942_v6, %v1102_v1  ;;  %v2944_v27 = vpop.eup %2943 }
 0x283   : > { %v1824_v28 = vadd.f32 1.0, %v2944_v27 }
 0x284   : > { %2708 = vmatmul.mubr.msk.f32.vlgmr.msra.gmra.mrb[0].mxu1 %vm1118_vm6, %v3442_v7 }
 0x285   : > { %2726 = vmatprep.mubr.msk.f32.mxu1 %vm3089_vm2, %v3090_v14  ;;  %2945 = vrcp.f32 %v1824_v28 }
 0x28f   : > { %v2946_v29 = vpop.eup %2945 }
 0x290   : > { %v1827_v30 = vmul.f32 %v2946_v29, %v3424_v43  ;;  %v1868_v43 = vld [vmem:[%s3342_s28] sm:$0xff]  ;;  %v3506_v29 = vld [vmem:[%s3333_s23 + $0x8] sm:$0xff] }
 0x291   : > { %v2805_v46 = vpack.c.bf16 %v1869_v44, %v1868_v43  ;;  %v3522_v43 = vld [vmem:[%s3333_s23] sm:$0xff] }
 0x292   : > { %v1830_v31 = vrot.slane %v1827_v30, 2  ;;  %v1831_v32 = vrot.slane %v1827_v30, 3  ;;  %v1833_v33 = vrot.slane %v1827_v30, 5  ;;  %v1835_v34 = vrot.slane %v1827_v30, 7 }
 0x293   : > { %v1829_v35 = vrot.slane %v1827_v30, 1  ;;  %v1832_v36 = vrot.slane %v1827_v30, 4  ;;  %v1834_v37 = vrot.slane %v1827_v30, 6  ;;  %2806 = vmatpush3.bf16.msra.mxu1 %v2805_v46 }
 0x294   : > { %2807 = vmatprep.subr.bf16.mxu1 %v3088_v11 }
 0x357   : > { %v1188_v9 = vpop.f32.mrb[0].mxu1 }
 0x358   : > { %1203 = vperm.xlu1 %2934, %v1188_v9   ;;  %v2709_v10 = vpop.f32.mrb[1].mxu1  ;;  %v1425_v12 = vrot.slane %v1188_v9, %v3418_v40  ;;  %v1458_v13 = vrot.slane %v1188_v9, %v1099_v51  ;;  %v1469_v16 = vrot.slane %v1188_v9, %v1468_v15  ;;  %v1436_v18 = vrot.slane %v1188_v9, %v3421_v41  ;;  %v1871_v51 = vld [vmem:[%s3342_s28 + $0x18] sm:$0xff]  ;;  %s3895_s28 = scalar_lea.vmem %s3813_s10, %s3284_s2 }
 0x359   : > { %v1480_v19 = vrot.slane %v1188_v9, %v1479_v17  ;;  %v1491_v22 = vrot.slane %v1188_v9, %v1490_v20  ;;  %v1447_v25 = vrot.slane %v1188_v9, %v1093_v45  ;;  %v1502_v26 = vrot.slane %v1188_v9, %v1501_v23 }
 0x35a   : > { %1427 = vbcast.lane.b32.xlu0 %v1425_v12, 256  ;;  %v2808_v53 = vpack.c.bf16 %v1871_v51, %v1870_v50 }
 0x35c   : > { %2935 = vset.pattern.permute.xlu1 %v3092_v8  ;;  %2809 = vmatpush3.bf16.msra.mxu1 %v2808_v53 }
 0x35d   : > { %1213 = vperm.xlu1 %2935, %v1188_v9   ;;  %2810 = vmatprep.subr.bf16.mxu1 %v3088_v11 }
 0x35e   : > { %1464 = vbcast.lane.b32.xlu0 %v1458_v13, 264 }
 0x360   : > { %2812 = vmatpush3.bf16.msra.mxu1 %v2811_v58 }
 0x361   : > { %1431 = vbcast.lane.b32.xlu1 %v1425_v12, 264  ;;  %2813 = vmatprep.subr.bf16.mxu1 %v3088_v11 }
 0x362   : > { %1475 = vbcast.lane.b32.xlu0 %v1469_v16, 264 }
 0x364   : > { %2815 = vmatpush3.bf16.msra.mxu1 %v2814_v63 }
 0x365   : > { %1438 = vbcast.lane.b32.xlu1 %v1436_v18, 256  ;;  %2816 = vmatprep.subr.bf16.mxu1 %v3088_v11 }
 0x366   : > { %1486 = vbcast.lane.b32.xlu0 %v1480_v19, 264 }
 0x369   : > { %1442 = vbcast.lane.b32.xlu1 %v1436_v18, 264 }
 0x36a   : > { %1497 = vbcast.lane.b32.xlu0 %v1491_v22, 264 }
 0x36d   : > { %1449 = vbcast.lane.b32.xlu1 %v1447_v25, 256 }
 0x36e   : > { %1508 = vbcast.lane.b32.xlu0 %v1502_v26, 264 }
 0x371   : > { %1453 = vbcast.lane.b32.xlu1 %v1447_v25, 264 }
 0x372   : > { %1651 = vbcast.lane.b32.xlu0 %v1436_v18, 280 }
 0x375   : > { %1460 = vbcast.lane.b32.xlu1 %v1458_v13, 256 }
 0x376   : > { %1659 = vbcast.lane.b32.xlu0 %v1447_v25, 280 }
 0x379   : > { %1471 = vbcast.lane.b32.xlu1 %v1469_v16, 256 }
 0x37a   : > { %1643 = vbcast.lane.b32.xlu0 %v1425_v12, 280 }
 0x37d   : > { %1482 = vbcast.lane.b32.xlu1 %v1480_v19, 256 }
 0x37e   : > { %1667 = vbcast.lane.b32.xlu0 %v1458_v13, 280 }
 0x381   : > { %1493 = vbcast.lane.b32.xlu1 %v1491_v22, 256 }
 0x382   : > { %1675 = vbcast.lane.b32.xlu0 %v1469_v16, 280 }
 0x385   : > { %1504 = vbcast.lane.b32.xlu1 %v1502_v26, 256 }
 0x386   : > { %1683 = vbcast.lane.b32.xlu0 %v1480_v19, 280 }
 0x389   : > { %1647 = vbcast.lane.b32.xlu1 %v1436_v18, 272 }
 0x38a   : > { %1691 = vbcast.lane.b32.xlu0 %v1491_v22, 280 }
 0x38d   : > { %1655 = vbcast.lane.b32.xlu1 %v1447_v25, 272 }
 0x38e   : > { %1699 = vbcast.lane.b32.xlu0 %v1502_v26, 280 }
 0x391   : > { %1639 = vbcast.lane.b32.xlu1 %v1425_v12, 272  ;;  %v3094_v12 = vmov 1966171168  }
 0x392   : > { %1840 = vrot.lane.b32.xlu0 %v1830_v31, %s3093_s1 }
 0x395   : > { %1663 = vbcast.lane.b32.xlu1 %v1458_v13, 272  ;;  %v1236_v13 = vunpack.c.l.s4 %v3094_v12 }
 0x396   : > { %1842 = vrot.lane.b32.xlu0 %v1831_v32, %s3093_s1 }
 0x399   : > { %1671 = vbcast.lane.b32.xlu1 %v1469_v16, 272  ;;  %v1237_v16 = vunpack.c.0.s8 %v1236_v13 }
 0x39a   : > { %1846 = vrot.lane.b32.xlu0 %v1833_v33, %s3093_s1 }
 0x39b   : > { %v3497_v20 = vsub.s32 %v1237_v16, %v3415_v39 }
 0x39d   : > { %1679 = vbcast.lane.b32.xlu1 %v1480_v19, 272 }
 0x39e   : > { %1850 = vrot.lane.b32.xlu0 %v1835_v34, %s3093_s1 }
 0x3a1   : > { %1687 = vbcast.lane.b32.xlu1 %v1491_v22, 272 }
 0x3a5   : > { %1695 = vbcast.lane.b32.xlu1 %v1502_v26, 272 }
 0x3a9   : > { %1838 = vrot.lane.b32.xlu1 %v1829_v35, %s3093_s1 }
 0x3ad   : > { %1836 = vrot.lane.b32.xlu1 %v1827_v30, %s3093_s1 }
 0x3b1   : > { %1844 = vrot.lane.b32.xlu1 %v1832_v36, %s3093_s1 }
 0x3b5   : > { %1848 = vrot.lane.b32.xlu1 %v1834_v37, %s3093_s1  ;;  %s3901_s1 = smov (!%p2617_p1), %s3900_s27 }
 0x3cc   : > { %v3486_v9 = vpop.permute.xlu0 %1427 }
 0x3d0   : > { %v3490_v15 = vpop.permute.xlu0 %1464 }
 0x3d4   : > { %v3494_v19 = vpop.permute.xlu0 %1475 }
 0x3d7   : > { %v1204_v45 = vpop.permute.xlu1 %1203 }
 0x3d8   : > { %v1210_v48 = vmul.f32 %v1209_v42, %v1204_v45  ;;  %v3502_v26 = vpop.permute.xlu0 %1486 }
 0x3da   : > { %v1211_v56 = vadd.f32 %v2609_v47, %v1210_v48 }
 0x3dc   : > { %v1214_v55 = vpop.permute.xlu1 %1213  ;;  %v3516_v35 = vpop.permute.xlu0 %1497 }
 0x3dd   : > { %v1220_v57 = vmul.f32 %v1219_v49, %v1214_v55 }
 0x3df   : > { %v1221_v61 = vadd.f32 %v1220_v57, %v1211_v56 }
 0x3e0   : > { %v3474_v62 = vpop.permute.xlu1 %1431  ;;  %v3533_v50 = vpop.permute.xlu0 %1508 }
 0x3e1   : > { %v1223_v41 = vand.u32 2147483647, %v1221_v61  ;;  %v1222_v21 = vmax.f32 %v1221_v61, 0.0 }
 0x3e3   : > { %v1224_v0 = vsub.f32 0.0, %v1223_v41 }
 0x3e4   : > { %v3477_v1 = vpop.permute.xlu1 %1438 }
 0x3e5   : > { %v1225_v2 = vmul.f32 1.442695, %v1224_v0  ;;  %v3544_v0 = vpop.permute.xlu0 %1651 }
 0x3e7   : > { %2947 = vpow2.f32 %v1225_v2 }
 0x3e8   : > { %v3480_v3 = vpop.permute.xlu1 %1442 }
 0x3ec   : > { %v3482_v4 = vpop.permute.xlu1 %1449 }
 0x3f0   : > { %v3484_v5 = vpop.permute.xlu1 %1453 }
 0x3f1   : > { %v2948_v6 = vpop.eup %2947 }
 0x3f2   : > { %v1227_v8 = vadd.f32 1.0, %v2948_v6 }
 0x3f4   : > { %2949 = vlog2.f32 %v1227_v8  ;;  %v3488_v10 = vpop.permute.xlu1 %1460 }
 0x3f8   : > { %v3492_v17 = vpop.permute.xlu1 %1471 }
 0x3fc   : > { %v3499_v24 = vpop.permute.xlu1 %1482 }
 0x3fe   : > { %v2950_v18 = vpop.eup %2949 }
 0x3ff   : > { %v1229_v22 = vmul.f32 0.6931472, %v2950_v18 }
 0x400   : > { %v3508_v30 = vpop.permute.xlu1 %1493 }
 0x401   : > { %v1230_v23 = vadd.f32 %v1229_v22, %v1222_v21 }
 0x403   : > { %v1241_v25 = vrot.slane %v1230_v23, %v3497_v20  ;;  %v3512_v31 = vmul.f32 %v1230_v23, %v3442_v7  ;;  %v1234_v33 = vcombine.high %v1230_v23, %v1230_v23 }
 0x404   : > { %v3524_v44 = vpop.permute.xlu1 %1504 }
 0x405   : > { %v1249_v27 = vcombine.high %v1241_v25, %v1241_v25  ;;  %v1257_v28 = vrot.slane %v1241_v25, %v3497_v20  ;;  %v1380_v42 = vrot.slane %v3512_v31, %v3497_v20  ;;  %v1248_v45 = vrot.slane %v1234_v33, %v3497_v20 }
 0x406   : > { %v1373_v33 = vcombine.high %v3512_v31, %v3512_v31 }
 0x407   : > { %v1271_v39 = vrot.slane %v1249_v27, %v3497_v20  ;;  %v1286_v32 = vrot.slane %v1257_v28, %v3418_v40  ;;  %v1279_v37 = vcombine.high %v1257_v28, %v1257_v28  ;;  %v3529_v47 = vrot.slane %v1380_v42, %v3497_v20 }
 0x408   : > { %v1250_v52 = vcombine.high %v1248_v45, %v1248_v45  ;;  %v1264_v54 = vrot.slane %v1248_v45, %v3497_v20  ;;  %v3537_v57 = vpop.permute.xlu1 %1647  ;;  %v1388_v61 = vcombine.high %v1380_v42, %v1380_v42  ;;  %v3561_v42 = vpop.permute.xlu0 %1659 }
 0x409   : > { %v1324_v34 = vmul.f32 %v1286_v32, %v3506_v29  ;;  %v1290_v36 = vrot.slane %v1271_v39, %v3418_v40  ;;  %v1294_v46 = vrot.slane %v1279_v37, %v3418_v40  ;;  %v1323_v48 = vmul.f32 %v1286_v32, %v3522_v43 }
 0x40a   : > { %v1281_v55 = vcombine.high %v1271_v39, %v1271_v39  ;;  %v1513_v58 = vrot.slane %v3529_v47, %v3418_v40  ;;  %v1278_v41 = vrot.slane %v1250_v52, %v3497_v20  ;;  %v1302_v63 = vrot.slane %v1264_v54, %v3418_v40 }
 0x40b   : > { %v1341_v38 = vmul.f32 1.442695, %v1324_v34  ;;  %v1325_v49 = vmul.f32 %v1290_v36, %v3522_v43  ;;  %v1326_v51 = vmul.f32 %v1290_v36, %v3506_v29  ;;  %v1339_v53 = vmul.f32 1.442695, %v1323_v48 }
 0x40c   : > { %v1327_v60 = vmul.f32 %v1294_v46, %v3522_v43  ;;  %v1298_v2 = vrot.slane %v1281_v55, %v3418_v40  ;;  %v1328_v6 = vmul.f32 %v1294_v46, %v3506_v29  ;;  %v1551_v12 = vmul.f32 %v1513_v58, %v3474_v62  ;;  %v3551_v23 = vpop.permute.xlu1 %1655 }
 0x40d   : > { %2951 = vpow2.f32 %v1341_v38  ;;  %v1345_v56 = vmul.f32 1.442695, %v1326_v51  ;;  %v1343_v59 = vmul.f32 1.442695, %v1325_v49  ;;  %v1410_v18 = vrot.slane %v1388_v61, %v3497_v20 }
 0x40e   : > { %2953 = vpow2.f32 %v1339_v53  ;;  %v1347_v13 = vmul.f32 1.442695, %v1327_v60  ;;  %v1330_v21 = vmul.f32 %v1298_v2, %v3506_v29  ;;  %v1349_v22 = vmul.f32 1.442695, %v1328_v6 }
 0x40f   : > { %2955 = vpow2.f32 %v1345_v56  ;;  %v1280_v25 = vcombine.high %v1264_v54, %v1264_v54  ;;  %v1306_v27 = vrot.slane %v1278_v41, %v3418_v40  ;;  %v1329_v28 = vmul.f32 %v1298_v2, %v3522_v43 }
 0x410   : > { %2957 = vpow2.f32 %v1343_v59  ;;  %v1332_v39 = vmul.f32 %v1302_v63, %v3506_v29  ;;  %v1353_v62 = vmul.f32 1.442695, %v1330_v21  ;;  %v1331_v36 = vmul.f32 %v1302_v63, %v3522_v43  ;;  %v3568_v53 = vpop.permute.xlu1 %1639 }
 0x411   : > { %2959 = vpow2.f32 %v1349_v22  ;;  %v1351_v34 = vmul.f32 1.442695, %v1329_v28  ;;  %v1282_v37 = vcombine.high %v1278_v41, %v1278_v41  ;;  %v1517_v38 = vrot.slane %v1410_v18, %v3418_v40 }
 0x412   : > { %2961 = vpow2.f32 %v1347_v13  ;;  %v1310_v46 = vrot.slane %v1280_v25, %v3418_v40  ;;  %v1334_v48 = vmul.f32 %v1306_v27, %v3506_v29  ;;  %v1418_v49 = vcombine.high %v3529_v47, %v3529_v47 }
 0x413   : > { %v1357_v31 = vmul.f32 1.442695, %v1332_v39  ;;  %v1550_v51 = vmul.f32 %v1513_v58, %v3486_v9  ;;  %2963 = vpow2.f32 %v1353_v62  ;;  %v1387_v55 = vrot.slane %v1373_v33, %v3497_v20 }
 0x414   : > { %2965 = vpow2.f32 %v1351_v34  ;;  %v1355_v56 = vmul.f32 1.442695, %v1331_v36  ;;  %v1333_v59 = vmul.f32 %v1306_v27, %v3522_v43  ;;  %v1314_v60 = vrot.slane %v1282_v37, %v3418_v40 }
 0x415   : > { %v1553_v47 = vmul.f32 %v1517_v38, %v3480_v3  ;;  %v1336_v9 = vmul.f32 %v1310_v46, %v3506_v29  ;;  %v1361_v58 = vmul.f32 1.442695, %v1334_v48  ;;  %v1420_v2 = vcombine.high %v1410_v18, %v1410_v18  ;;  %v3581_v18 = vpop.permute.xlu1 %1663 }
 0x416   : > { %v1521_v6 = vrot.slane %v1418_v49, %v3418_v40  ;;  %2967 = vpow2.f32 %v1357_v31  ;;  %v1359_v21 = vmul.f32 1.442695, %v1333_v59  ;;  %v1335_v22 = vmul.f32 %v1310_v46, %v3522_v43 }
 0x417   : > { %v2952_v8 = vpop.eup %2951  ;;  %2969 = vpow2.f32 %v1355_v56  ;;  %v1403_v25 = vrot.slane %v1387_v55, %v3497_v20  ;;  %v1389_v27 = vcombine.high %v1387_v55, %v1387_v55  ;;  %v1338_v39 = vmul.f32 %v1314_v60, %v3506_v29 }
 0x418   : > { %v1567_v16 = vmul.f32 0.0, %v2952_v8  ;;  %v2954_v45 = vpop.eup %2953  ;;  %v1552_v8 = vmul.f32 %v1517_v38, %v3477_v1  ;;  %v1555_v33 = vmul.f32 %v1521_v6, %v3484_v5  ;;  %2971 = vpow2.f32 %v1361_v58 }
 0x419   : > { %v1566_v52 = vmul.f32 0.0, %v2954_v45  ;;  %v2956_v54 = vpop.eup %2955  ;;  %v1365_v34 = vmul.f32 1.442695, %v1336_v9  ;;  %v1554_v36 = vmul.f32 %v1521_v6, %v3482_v4  ;;  %2973 = vpow2.f32 %v1359_v21  ;;  %v3599_v59 = vpop.permute.xlu1 %1671 }
 0x41a   : > { %v1569_v32 = vadd.f32 %v1567_v16, %v1551_v12  ;;  %v2958_v63 = vpop.eup %2957  ;;  %v1644_v16 = vpop.permute.xlu0 %1643  ;;  %v1363_v45 = vmul.f32 1.442695, %v1335_v22  ;;  %v1337_v46 = vmul.f32 %v1314_v60, %v3522_v43  ;;  %v3590_v29 = vrot.slane %v1389_v27, %v3497_v20 }
 0x41b   : > { %v1568_v61 = vadd.f32 %v1566_v52, %v1550_v51  ;;  %v2960_v3 = vpop.eup %2959  ;;  %v1369_v51 = vmul.f32 1.442695, %v1338_v39  ;;  %v1529_v52 = vrot.slane %v1403_v25, %v3418_v40  ;;  %2975 = vpow2.f32 %v1365_v34 }
 0x41c   : > { %1571 = vst.msk [vmem:[#allocation3 + $0x8] sm:$0xff] %vm1118_vm6, %v1569_v32  ;;  %v1573_v41 = vmul.f32 %v2956_v54, %v1569_v32  ;;  %v2962_v1 = vpop.eup %2961  ;;  %v1525_v32 = vrot.slane %v1420_v2, %v3418_v40  ;;  %v1419_v60 = vcombine.high %v1403_v25, %v1403_v25  ;;  %2977 = vpow2.f32 %v1363_v45 }
 0x41d   : > { %1570 = vst.msk [vmem:[#allocation3] sm:$0xff] %vm1118_vm6, %v1568_v61  ;;  %v1572_v12 = vmul.f32 %v2958_v63, %v1568_v61  ;;  %v2964_v48 = vpop.eup %2963  ;;  %2979 = vpow2.f32 %v1369_v51  ;;  %v1558_v22 = vmul.f32 %v1529_v52, %v3492_v17 }
 0x41e   : > { %v1575_v13 = vadd.f32 %v1573_v41, %v1553_v47  ;;  %v3592_v31 = vpop.permute.xlu0 %1667  ;;  %v2966_v5 = vpop.eup %2965  ;;  %v1557_v4 = vmul.f32 %v1525_v32, %v3490_v15  ;;  %v1556_v43 = vmul.f32 %v1525_v32, %v3488_v10  ;;  %v1367_v41 = vmul.f32 1.442695, %v1337_v46 }
 0x41f   : > { %v1574_v28 = vadd.f32 %v1572_v12, %v1552_v8  ;;  %v1533_v15 = vrot.slane %v3590_v29, %v3418_v40  ;;  %v1559_v10 = vmul.f32 %v1529_v52, %v3494_v19  ;;  %v1537_v25 = vrot.slane %v1419_v60, %v3418_v40 }
 0x420   : > { %1578 = vst.msk [vmem:[#allocation3 + $0x18] sm:$0xff] %vm1118_vm6, %v1575_v13  ;;  %v1580_v62 = vmul.f32 %v2960_v3, %v1575_v13  ;;  %v2968_v63 = vpop.eup %2967  ;;  %v1421_v19 = vcombine.high %v3590_v29, %v3590_v29  ;;  %2981 = vpow2.f32 %v1367_v41 }
 0x421   : > { %1577 = vst.msk [vmem:[#allocation3 + $0x10] sm:$0xff] %vm1118_vm6, %v1574_v28  ;;  %v1579_v37 = vmul.f32 %v2962_v1, %v1574_v28  ;;  %v2970_v6 = vpop.eup %2969 }
 0x422   : > { %v1582_v38 = vadd.f32 %v1580_v62, %v1555_v33  ;;  %v1676_v21 = vpop.permute.xlu0 %1675  ;;  %v2972_v28 = vpop.eup %2971  ;;  %v1541_v51 = vrot.slane %v1421_v19, %v3418_v40  ;;  %v1562_v40 = vmul.f32 %v1537_v25, %v3508_v30 }
 0x423   : > { %v1581_v49 = vadd.f32 %v1579_v37, %v1554_v36  ;;  %v1622_v54 = vld [vmem:[#allocation3 + $0x8] sm:$0xff]  ;;  %v3617_v62 = vpop.permute.xlu1 %1679 }
 0x424   : > { %1585 = vst.msk [vmem:[#allocation3 + $0x28] sm:$0xff] %vm1118_vm6, %v1582_v38  ;;  %v1587_v55 = vmul.f32 %v2964_v48, %v1582_v38  ;;  %v1621_v56 = vld [vmem:[#allocation3] sm:$0xff]  ;;  %v1702_v9 = vmul.f32 %v1644_v16, %v1622_v54 }
 0x425   : > { %1584 = vst.msk [vmem:[#allocation3 + $0x20] sm:$0xff] %vm1118_vm6, %v1581_v49  ;;  %v1586_v20 = vmul.f32 %v2966_v5, %v1581_v49  ;;  %v1701_v13 = vmul.f32 %v3568_v53, %v1621_v56  ;;  %v1561_v53 = vmul.f32 %v1533_v15, %v3502_v26  ;;  %v1560_v26 = vmul.f32 %v1533_v15, %v3499_v24 }
 0x426   : > { %v1589_v61 = vadd.f32 %v1587_v55, %v1557_v4  ;;  %v1718_v1 = vsel %vm1118_vm6, %v1702_v9, 0.0  ;;  %v1684_v54 = vpop.permute.xlu0 %1683 }
 0x427   : > { %v1624_v47 = vld [vmem:[#allocation3 + $0x18] sm:$0xff]  ;;  %v1588_v58 = vadd.f32 %v1586_v20, %v1556_v43  ;;  %v1717_v38 = vsel %vm1118_vm6, %v1701_v13, 0.0  ;;  %v1563_v20 = vmul.f32 %v1537_v25, %v3516_v35 }
 0x428   : > { %v1704_v2 = vmul.f32 %v3544_v0, %v1624_v47  ;;  %1592 = vst.msk [vmem:[#allocation3 + $0x38] sm:$0xff] %vm1118_vm6, %v1589_v61  ;;  %v1594_v8 = vmul.f32 %v2968_v63, %v1589_v61  ;;  %v1623_v12 = vld [vmem:[#allocation3 + $0x10] sm:$0xff]  ;;  %v1719_v55 = vadd.f32 %v1718_v1, %v1717_v38  ;;  %v1688_v47 = vpop.permute.xlu1 %1687 }
 0x429   : > { %1591 = vst.msk [vmem:[#allocation3 + $0x30] sm:$0xff] %vm1118_vm6, %v1588_v58  ;;  %v1593_v3 = vmul.f32 %v2970_v6, %v1588_v58  ;;  %v1703_v16 = vmul.f32 %v3537_v57, %v1623_v12  ;;  %v2974_v57 = vpop.eup %2973 }
 0x42a   : > { %v1727_v0 = vsel %vm1118_vm6, %v1704_v2, 0.0  ;;  %v1596_v27 = vadd.f32 %v1594_v8, %v1559_v10  ;;  %v2976_v5 = vpop.eup %2975  ;;  %v1565_v2 = vmul.f32 %v1541_v51, %v3533_v50  ;;  %v1720_v10 = vrot.slane %v1719_v55, 4 }
 0x42b   : > { %v1595_v39 = vadd.f32 %v1593_v3, %v1558_v22  ;;  %v1726_v17 = vsel %vm1118_vm6, %v1703_v16, 0.0  ;;  %v1626_v32 = vld [vmem:[#allocation3 + $0x28] sm:$0xff]  ;;  %v2978_v43 = vpop.eup %2977  ;;  %v1692_v16 = vpop.permute.xlu0 %1691 }
 0x42c   : > { %1599 = vst.msk [vmem:[#allocation3 + $0x48] sm:$0xff] %vm1118_vm6, %v1596_v27  ;;  %v1601_v33 = vmul.f32 %v2972_v28, %v1596_v27  ;;  %v1728_v34 = vadd.f32 %v1727_v0, %v1726_v17  ;;  %v1625_v36 = vld [vmem:[#allocation3 + $0x20] sm:$0xff]  ;;  %v1706_v37 = vmul.f32 %v3561_v42, %v1626_v32  ;;  %v2980_v63 = vpop.eup %2979  ;;  %v1564_v0 = vmul.f32 %v1541_v51, %v3524_v44  ;;  %v1696_v32 = vpop.permute.xlu1 %1695 }
 0x42d   : > { %1598 = vst.msk [vmem:[#allocation3 + $0x40] sm:$0xff] %vm1118_vm6, %v1595_v39  ;;  %v1600_v45 = vmul.f32 %v2974_v57, %v1595_v39  ;;  %v1705_v46 = vmul.f32 %v3551_v23, %v1625_v36  ;;  %v2982_v12 = vpop.eup %2981 }
 0x42e   : > { %v1603_v48 = vadd.f32 %v1601_v33, %v1561_v53  ;;  %v1729_v29 = vrot.slane %v1728_v34, 4  ;;  %v1736_v49 = vsel %vm1118_vm6, %v1706_v37, 0.0  ;;  %v1721_v33 = vadd.f32 %v1720_v10, %v1719_v55 }
 0x42f   : > { %v1628_v52 = vld [vmem:[#allocation3 + $0x38] sm:$0xff]  ;;  %v1602_v4 = vadd.f32 %v1600_v45, %v1560_v26  ;;  %v1735_v42 = vsel %vm1118_vm6, %v1705_v46, 0.0 }
 0x430   : > { %1606 = vst.msk [vmem:[#allocation3 + $0x58] sm:$0xff] %vm1118_vm6, %v1603_v48  ;;  %v1608_v24 = vmul.f32 %v2976_v5, %v1603_v48  ;;  %v1708_v23 = vmul.f32 %v3592_v31, %v1628_v52  ;;  %v1737_v56 = vadd.f32 %v1736_v49, %v1735_v42  ;;  %v1627_v60 = vld [vmem:[#allocation3 + $0x30] sm:$0xff]  ;;  %v1730_v35 = vadd.f32 %v1729_v29, %v1728_v34  ;;  %v2610_v46 = vld [vmem:[%s3895_s28] ss:$0 sm:$0xff]  ;;  %v1700_v29 = vpop.permute.xlu0 %1699 }
 0x431   : > { %1605 = vst.msk [vmem:[#allocation3 + $0x50] sm:$0xff] %vm1118_vm6, %v1602_v4  ;;  %v1607_v61 = vmul.f32 %v2978_v43, %v1602_v4  ;;  %v1707_v41 = vmul.f32 %v3581_v18, %v1627_v60  ;;  %v1722_v52 = vrot.slane %v1721_v33, 2  ;;  %v1839_v43 = vpop.permute.xlu1 %1838 }
 0x432   : > { %v1610_v15 = vadd.f32 %v1608_v24, %v1563_v20  ;;  %v1745_v9 = vsel %vm1118_vm6, %v1708_v23, 0.0  ;;  %v1738_v58 = vrot.slane %v1737_v56, 4  ;;  %v1731_v28 = vrot.slane %v1730_v35, 2 }
 0x433   : > { %v1630_v6 = vld [vmem:[#allocation3 + $0x48] sm:$0xff]  ;;  %v1609_v31 = vadd.f32 %v1607_v61, %v1562_v40  ;;  %v1744_v8 = vsel %vm1118_vm6, %v1707_v41, 0.0  ;;  %v3654_v20 = vmul.f32 %v2610_v46, %v3442_v7 }
 0x434   : > { %1613 = vst.msk [vmem:[#allocation3 + $0x68] sm:$0xff] %vm1118_vm6, %v1610_v15  ;;  %v1615_v30 = vmul.f32 %v2980_v63, %v1610_v15  ;;  %v1710_v13 = vmul.f32 %v1676_v21, %v1630_v6  ;;  %v1739_v18 = vadd.f32 %v1738_v58, %v1737_v56  ;;  %v1746_v22 = vadd.f32 %v1745_v9, %v1744_v8  ;;  %v1629_v3 = vld [vmem:[#allocation3 + $0x40] sm:$0xff] }
 0x435   : > { %1612 = vst.msk [vmem:[#allocation3 + $0x60] sm:$0xff] %vm1118_vm6, %v1609_v31  ;;  %v1614_v25 = vmul.f32 %v2982_v12, %v1609_v31  ;;  %v1709_v50 = vmul.f32 %v3599_v59, %v1629_v3  ;;  %v1732_v45 = vadd.f32 %v1731_v28, %v1730_v35  ;;  %v1723_v58 = vadd.f32 %v1722_v52, %v1721_v33 }
 0x436   : > { %v1617_v19 = vadd.f32 %v1615_v30, %v1565_v2  ;;  %v1754_v27 = vsel %vm1118_vm6, %v1710_v13, 0.0  ;;  %v1747_v53 = vrot.slane %v1746_v22, 4  ;;  %v1740_v21 = vrot.slane %v1739_v18, 2  ;;  %v1841_v2 = vpop.permute.xlu0 %1840 }
 0x437   : > { %v1632_v1 = vld [vmem:[#allocation3 + $0x58] sm:$0xff]  ;;  %v1616_v39 = vadd.f32 %v1614_v25, %v1564_v0  ;;  %v1753_v17 = vsel %vm1118_vm6, %v1709_v50, 0.0  ;;  %v1733_v56 = vrot.slane %v1732_v45, 1  ;;  %v1798_v8 = vrot.slane %v3654_v20, 1 }
 0x438   : > { %1620 = vst.msk [vmem:[#allocation3 + $0x78] sm:$0xff] %vm1118_vm6, %v1617_v19  ;;  %v1712_v57 = vmul.f32 %v1684_v54, %v1632_v1  ;;  %v1748_v44 = vadd.f32 %v1747_v53, %v1746_v22  ;;  %v1755_v34 = vadd.f32 %v1754_v27, %v1753_v17  ;;  %v1631_v36 = vld [vmem:[#allocation3 + $0x50] sm:$0xff]  ;;  %v1741_v49 = vadd.f32 %v1740_v21, %v1739_v18  ;;  %v1837_v22 = vpop.permute.xlu1 %1836 }
 0x439   : > { %1619 = vst.msk [vmem:[#allocation3 + $0x70] sm:$0xff] %vm1118_vm6, %v1616_v39  ;;  %v1711_v59 = vmul.f32 %v3617_v62, %v1631_v36  ;;  %v1734_v12 = vadd.f32 %v1733_v56, %v1732_v45  ;;  %v1724_v50 = vrot.slane %v1723_v58, 1  ;;  %v1799_v19 = vrot.slane %v3654_v20, 2 }
 0x43a   : > { %v1763_v37 = vsel %vm1118_vm6, %v1712_v57, 0.0  ;;  %v1749_v38 = vrot.slane %v1748_v44, 2  ;;  %v1756_v26 = vrot.slane %v1755_v34, 4  ;;  %v1742_v40 = vrot.slane %v1741_v49, 1  ;;  %v1843_v17 = vpop.permute.xlu0 %1842 }
 0x43b   : > { %v1634_v48 = vld [vmem:[#allocation3 + $0x68] sm:$0xff]  ;;  %v1762_v5 = vsel %vm1118_vm6, %v1711_v59, 0.0  ;;  %v1800_v53 = vrot.slane %v3654_v20, 3  ;;  %v1814_v21 = vadd.f32 %v1798_v8, %v1734_v12  ;;  %v1801_v33 = vrot.slane %v3654_v20, 4 }
 0x43c   : > { %v1714_v51 = vmul.f32 %v1692_v16, %v1634_v48  ;;  %v1750_v54 = vadd.f32 %v1749_v38, %v1748_v44  ;;  %v1757_v4 = vadd.f32 %v1756_v26, %v1755_v34  ;;  %v1633_v62 = vld [vmem:[#allocation3 + $0x60] sm:$0xff]  ;;  %v1764_v42 = vadd.f32 %v1763_v37, %v1762_v5  ;;  %v1845_v26 = vpop.permute.xlu1 %1844 }
 0x43d   : > { %v1713_v55 = vmul.f32 %v1688_v47, %v1633_v62  ;;  %v1743_v30 = vadd.f32 %v1742_v40, %v1741_v49  ;;  %v1725_v36 = vadd.f32 %v1724_v50, %v1723_v58  ;;  %v1802_v37 = vrot.slane %v3654_v20, 5 }
 0x43e   : > { %v1772_v24 = vsel %vm1118_vm6, %v1714_v51, 0.0  ;;  %v1758_v23 = vrot.slane %v1757_v4, 2  ;;  %v1765_v61 = vrot.slane %v1764_v42, 4  ;;  %v1751_v15 = vrot.slane %v1750_v54, 1 }
 0x43f   : > { %v1636_v60 = vld [vmem:[#allocation3 + $0x78] sm:$0xff]  ;;  %v1771_v41 = vsel %vm1118_vm6, %v1713_v55, 0.0  ;;  %v1861_v48 = vmul.f32 %v1839_v43, %v1814_v21  ;;  %v1803_v51 = vrot.slane %v3654_v20, 6  ;;  %v1804_v40 = vrot.slane %v3654_v20, 7 }
 0x440   : > { %v1716_v63 = vmul.f32 %v1700_v29, %v1636_v60  ;;  %v1773_v9 = vadd.f32 %v1772_v24, %v1771_v41  ;;  %v1635_v35 = vld [vmem:[#allocation3 + $0x70] sm:$0xff]  ;;  %v1766_v47 = vadd.f32 %v1765_v61, %v1764_v42  ;;  %v1759_v31 = vadd.f32 %v1758_v23, %v1757_v4  ;;  %v1847_v42 = vpop.permute.xlu0 %1846  ;;  %v1849_v61 = vpop.permute.xlu1 %1848 }
 0x441   : > { %v1715_v6 = vmul.f32 %v1696_v32, %v1635_v35  ;;  %v1752_v16 = vadd.f32 %v1751_v15, %v1750_v54  ;;  %v1815_v32 = vadd.f32 %v1799_v19, %v1743_v30  ;;  %v1813_v54 = vadd.f32 %v3654_v20, %v1725_v36  ;;  %v2612_v36 = vld [vmem:[%s3896_s16] ss:$0 sm:$0xff] }
 0x442   : > { %v1781_v7 = vsel %vm1118_vm6, %v1716_v63, 0.0  ;;  %v1774_v10 = vrot.slane %v1773_v9, 4  ;;  %v1767_v13 = vrot.slane %v1766_v47, 2  ;;  %v1760_v3 = vrot.slane %v1759_v31, 1 }
 0x443   : > { %v1780_v18 = vsel %vm1118_vm6, %v1715_v6, 0.0  ;;  %v1816_v44 = vadd.f32 %v1800_v53, %v1752_v16  ;;  %v1862_v5 = vmul.f32 %v1841_v2, %v1815_v32  ;;  %v1884_v23 = vrot.slane %v1861_v48, 7 }
 0x444   : > { %v1775_v0 = vadd.f32 %v1774_v10, %v1773_v9  ;;  %v1782_v25 = vadd.f32 %v1781_v7, %v1780_v18  ;;  %v1768_v27 = vadd.f32 %v1767_v13, %v1766_v47  ;;  %v1761_v28 = vadd.f32 %v1760_v3, %v1759_v31  ;;  %v1851_v6 = vpop.permute.xlu0 %1850  ;;  %v2989_v3 = vld [vmem:[#allocation2] sm:$0xff] }
 0x445   : > { %v1863_v4 = vmul.f32 %v1843_v17, %v1816_v44  ;;  %v1887_v43 = vrot.slane %v1862_v5, 6  ;;  %v1860_v63 = vmul.f32 %v1837_v22, %v1813_v54  ;;  %v2010_v17 = vld [vmem:[%s3355_s21 + $0x18] sm:$0xff] }
 0x446   : > { %v1776_v1 = vrot.slane %v1775_v0, 2  ;;  %v1783_v39 = vrot.slane %v1782_v25, 4  ;;  %v1769_v57 = vrot.slane %v1768_v27, 1  ;;  %v1817_v45 = vadd.f32 %v1801_v33, %v1761_v28 }
 0x447   : > { %v1890_v15 = vrot.slane %v1863_v4, 5  ;;  %v1886_v2 = vsel %vm1885_vm7, %v1884_v23, %v1860_v63  ;;  %v2124_v4 = vld [vmem:[%s3365_s11 + $0x30] sm:$0xff] }
 0x448   : > { %v1784_v34 = vadd.f32 %v1783_v39, %v1782_v25  ;;  %v1777_v59 = vadd.f32 %v1776_v1, %v1775_v0  ;;  %v1770_v38 = vadd.f32 %v1769_v57, %v1768_v27  ;;  %v1864_v55 = vmul.f32 %v1845_v26, %v1817_v45  ;;  %v2008_v1 = vld [vmem:[%s3355_s21 + $0x8] sm:$0xff]  ;;  %v2009_v39 = vld [vmem:[%s3355_s21 + $0x10] sm:$0xff]  ;;  %v2118_v45 = vld [vmem:[%s3365_s11] sm:$0xff] }
 0x449   : > { %v1889_v31 = vsel %vm1888_vm8, %v1887_v43, %v1886_v2  ;;  %v2820_v32 = vpack.c.bf16 %v2010_v17, %v2009_v39  ;;  %v2130_v43 = vld [vmem:[%s3365_s11 + $0x60] sm:$0xff]  ;;  %v2132_v63 = vld [vmem:[%s3365_s11 + $0x70] sm:$0xff] }
 0x44a   : > { %v1785_v46 = vrot.slane %v1784_v34, 2  ;;  %v1778_v29 = vrot.slane %v1777_v59, 1  ;;  %v1818_v49 = vadd.f32 %v1802_v37, %v1770_v38  ;;  %v1893_v35 = vrot.slane %v1864_v55, 4  ;;  %v2613_v37 = vld [vmem:[%s3897_s6] ss:$0 sm:$0xff] }
 0x44b   : > { %v1892_v10 = vsel %vm1891_vm9, %v1890_v15, %v1889_v31  ;;  %v2126_v55 = vld [vmem:[%s3365_s11 + $0x40] sm:$0xff]  ;;  %v2133_v15 = vld [vmem:[%s3365_s11 + $0x78] sm:$0xff] }
 0x44c   : > { %v1786_v52 = vadd.f32 %v1785_v46, %v1784_v34  ;;  %v1779_v62 = vadd.f32 %v1778_v29, %v1777_v59  ;;  %v1865_v60 = vmul.f32 %v1847_v42, %v1818_v49  ;;  %v1895_v8 = vsel %vm1894_vm10, %v1893_v35, %v1892_v10  ;;  %v2119_v46 = vld [vmem:[%s3365_s11 + $0x8] sm:$0xff]  ;;  %v2120_v29 = vld [vmem:[%s3365_s11 + $0x10] sm:$0xff]  ;;  %v2121_v49 = vld [vmem:[%s3365_s11 + $0x18] sm:$0xff] }
 0x44d   : > { %v2823_v48 = vpack.c.bf16 %v2119_v46, %v2118_v45  ;;  %v2826_v5 = vpack.c.bf16 %v2121_v49, %v2120_v29  ;;  %v2614_v35 = vld [vmem:[%s934_s0] ss:$0 sm:$0xff]  ;;  %v2249_v29 = vld [vmem:[%s3901_s1 + $0x10] sm:$0xff] (!%p2617_p1)  ;;  %v3096_v49 = vmov (!%p2617_p1), 0.0|0.0  }
 0x44e   : > { %v1787_v24 = vrot.slane %v1786_v52, 1  ;;  %v1819_v56 = vadd.f32 %v1803_v51, %v1779_v62  ;;  %v1896_v47 = vrot.slane %v1865_v60, 3  ;;  %v2122_v51 = vld [vmem:[%s3365_s11 + $0x20] sm:$0xff]  ;;  %v2125_v62 = vld [vmem:[%s3365_s11 + $0x38] sm:$0xff] }
 0x44f   : > { %2824 = vmatpush3.bf16.msra.mxu0 %v2823_v48  ;;  %v2832_v42 = vpack.c.bf16 %v2125_v62, %v2124_v4  ;;  %v2129_v60 = vld [vmem:[%s3365_s11 + $0x58] sm:$0xff]  ;;  %v2247_v48 = vld [vmem:[%s3900_s27] sm:$0xff] (!%p2617_p1) }
 0x450   : > { %v1788_v41 = vadd.f32 %v1787_v24, %v1786_v52  ;;  %v1866_v9 = vmul.f32 %v1849_v61, %v1819_v56  ;;  %v1898_v12 = vsel %vm1897_vm11, %v1896_v47, %v1895_v8  ;;  %2825 = vmatprep.subr.bf16.mxu0 %v3088_v11  ;;  %v2123_v52 = vld [vmem:[%s3365_s11 + $0x28] sm:$0xff]  ;;  %v2128_v56 = vld [vmem:[%s3365_s11 + $0x50] sm:$0xff] }
 0x451   : > { %v2829_v54 = vpack.c.bf16 %v2123_v52, %v2122_v51  ;;  %v2127_v24 = vld [vmem:[%s3365_s11 + $0x48] sm:$0xff]  ;;  %v2250_v51 = vld [vmem:[%s3901_s1 + $0x18] sm:$0xff] (!%p2617_p1)  ;;  %v3098_v52 = vmov (!%p2617_p1), 0.0  }
 0x452   : > { %v1820_v58 = vadd.f32 %v1804_v40, %v1788_v41  ;;  %v1899_v7 = vrot.slane %v1866_v9, 2  ;;  %v2835_v23 = vpack.c.bf16 %v2127_v24, %v2126_v55  ;;  %v2838_v40 = vpack.c.bf16 %v2129_v60, %v2128_v56  ;;  %v2131_v61 = vld [vmem:[%s3365_s11 + $0x68] sm:$0xff]  ;;  %v2618_v24 = vld [vmem:[%s3902_s5] ss:$0 sm:$0xff] (!%p2617_p1) }
 0x453   : > { %2827 = vmatpush3.bf16.msra.mxu0 %v2826_v5  ;;  %v2841_v41 = vpack.c.bf16 %v2131_v61, %v2130_v43  ;;  %v2844_v9 = vpack.c.bf16 %v2133_v15, %v2132_v63  ;;  %v2619_v56 = vld [vmem:[%s3903_s26] ss:$0 sm:$0xff] (!%p2617_p1) }
 0x454   : > { %v1867_v20 = vmul.f32 %v1851_v6, %v1820_v58  ;;  %v1901_v13 = vsel %vm1900_vm12, %v1899_v7, %v1898_v12  ;;  %2828 = vmatprep.subr.bf16.mxu0 %v3088_v11 }
 0x456   : > { %v1902_v30 = vrot.slane %v1867_v20, 1 }
 0x457   : > { %2830 = vmatpush3.bf16.msra.mxu0 %v2829_v54  ;;  %v2850_v54 = vpack.c.bf16 (!%p2617_p1), %v2250_v51, %v2249_v29 }
 0x458   : > { %v1904_v18 = vsel %vm1903_vm13, %v1902_v30, %v1901_v13  ;;  %2831 = vmatprep.subr.bf16.mxu0 %v3088_v11 }
 0x459   : > { %2727 = vmatmul.mubr.msk.f32.vlgmr.msra.gmra.mrb[2].mxu1 %vm1118_vm6, %v1904_v18 }
 0x45a   : > { %2737 = vmatprep.mubr.msk.f32.mxu1 %vm3089_vm2, %v3090_v14  ;;  %v2007_v14 = vld [vmem:[%s3355_s21] sm:$0xff]  ;;  %vm2325_vm2 = vcmask (!%p2617_p1), 32768  }
 0x45b   : > { %v2817_v21 = vpack.c.bf16 %v2008_v1, %v2007_v14  ;;  %2833 = vmatpush3.bf16.msra.mxu0 %v2832_v42  ;;  %v3095_v14 = vmov -1.0  }
 0x45c   : > { %2834 = vmatprep.subr.bf16.mxu0 %v3088_v11 }
 0x45d   : > { %2818 = vmatpush3.bf16.msra.mxu1 %v2817_v21 }
 0x45e   : > { %2819 = vmatprep.subr.bf16.mxu1 %v3088_v11 }
 0x45f   : > { %2836 = vmatpush3.bf16.msra.mxu0 %v2835_v23 }
 0x460   : > { %2837 = vmatprep.subr.bf16.mxu0 %v3088_v11 }
 0x461   : > { %2821 = vmatpush3.bf16.msra.mxu1 %v2820_v32 }
 0x463   : > { %2839 = vmatpush3.bf16.msra.mxu0 %v2838_v40 }
 0x464   : > { %2840 = vmatprep.subr.bf16.mxu0 %v3088_v11 }
 0x467   : > { %2842 = vmatpush3.bf16.msra.mxu0 %v2841_v41 }
 0x468   : > { %2843 = vmatprep.subr.bf16.mxu0 %v3088_v11 }
 0x46b   : > { %2845 = vmatpush3.bf16.msra.mxu0 %v2844_v9 }
 0x46c   : > { %2846 = vmatprep.subr.bf16.mxu0 (!%p2617_p1), %v3096_v49 }
 0x52c   : > { %v1973_v22 = vpop.f32.mrb[2].mxu1 }
 0x52d   : > { %v3671_v16 = vadd.f32 %v2989_v3, %v1973_v22  ;;  %v2728_v0 = vpop.f32.mrb[3].mxu1 }
 0x52f   : > { %v1980_v25 = vsel %vm953_vm1, %v3671_v16, 0.0 }
 0x530   : > { %1981 = vadd.xlane.f32.xlu1 %v1980_v25 }
 0x5bd   : > { %v1982_v50 = vpop.xlane.xlu1 %1981 }
 0x5be   : > { %v1983_v19 = vmul.f32 0.03125, %v1982_v50 }
 0x5c0   : > { %v1984_v27 = vsub.f32 %v3671_v16, %v1983_v19 }
 0x5c2   : > { %v1985_v28 = vmul.f32 %v1984_v27, %v1984_v27 }
 0x5c4   : > { %v1986_v53 = vsel %vm953_vm1, %v1985_v28, 0.0 }
 0x5c5   : > { %1987 = vadd.xlane.f32.xlu0 %v1986_v53 }
 0x652   : > { %v1988_v57 = vpop.xlane.xlu0 %1987 }
 0x653   : > { %v1989_v33 = vmul.f32 0.03125, %v1988_v57  ;;  %v2616_v57 = vld [vmem:[%s942_s24] ss:$0 sm:$0xff] }
 0x655   : > { %v1990_v44 = vadd.f32 1e-05, %v1989_v33 }
 0x657   : > { %2983 = vrsqrt.f32 %v1990_v44 }
 0x661   : > { %v2984_v34 = vpop.eup %2983 }
 0x662   : > { %v1992_v59 = vmul.f32 %v2984_v34, %v1984_v27 }
 0x664   : > { %v1999_v38 = vmul.f32 %v2612_v36, %v1992_v59 }
 0x666   : > { %v2006_v26 = vadd.f32 %v2613_v37, %v1999_v38 }
 0x668   : > { %2738 = vmatmul.mubr.msk.f32.vlgmr.msra.gmra.mrb[4].mxu1 %vm953_vm1, %v2006_v26 }
 0x73b   : > { %v2087_v58 = vpop.f32.mrb[4].mxu1 }
 0x73c   : > { %v2088_v2 = vadd.f32 %v2614_v35, %v2087_v58  ;;  %v2739_v47 = vpop.f32.mrb[5].mxu1 }
 0x73e   : > { %v2092_v6 = vmul.f32 0.70710677, %v2088_v2  ;;  %v2091_v21 = vmul.f32 0.5, %v2088_v2 }
 0x740   : > { %v2095_v31 = vand.u32 2147483647, %v2092_v6  ;;  %vm2093_vm14 = vcmp.ge.f32.partialorder %v2092_v6, 0.0 }
 0x741   : > { %v2094_v1 = vsel %vm2093_vm14, 1.0, %v3095_v14 }
 0x742   : > { %v2096_v7 = vmul.f32 0.3275911, %v2095_v31  ;;  %v2109_v20 = vsub.f32 0.0, %v2095_v31 }
 0x744   : > { %v2097_v10 = vadd.f32 1.0, %v2096_v7  ;;  %v2110_v12 = vmul.f32 %v2109_v20, %v2095_v31 }
 0x746   : > { %2985 = vrcp.f32 %v2097_v10  ;;  %v2111_v11 = vmul.f32 1.442695, %v2110_v12 }
 0x748   : > { %2987 = vpow2.f32 %v2111_v11 }
 0x750   : > { %v2986_v8 = vpop.eup %2985 }
 0x751   : > { %v2100_v30 = vmul.f32 1.0614054, %v2986_v8 }
 0x752   : > { %v2988_v27 = vpop.eup %2987 }
 0x753   : > { %v2101_v13 = vadd.f32 -1.4531521, %v2100_v30 }
 0x755   : > { %v2102_v18 = vmul.f32 %v2986_v8, %v2101_v13 }
 0x757   : > { %v2103_v22 = vadd.f32 1.4214138, %v2102_v18 }
 0x759   : > { %v2104_v3 = vmul.f32 %v2986_v8, %v2103_v22 }
 0x75b   : > { %v2105_v0 = vadd.f32 -0.28449672, %v2104_v3 }
 0x75d   : > { %v2106_v25 = vmul.f32 %v2986_v8, %v2105_v0 }
 0x75f   : > { %v2107_v50 = vadd.f32 0.2548296, %v2106_v25 }
 0x761   : > { %v2108_v19 = vmul.f32 %v2986_v8, %v2107_v50 }
 0x763   : > { %v2113_v28 = vmul.f32 %v2988_v27, %v2108_v19 }
 0x765   : > { %v2114_v53 = vsub.f32 1.0, %v2113_v28 }
 0x767   : > { %v2115_v39 = vmul.f32 %v2114_v53, %v2094_v1 }
 0x769   : > { %v2116_v17 = vadd.f32 1.0, %v2115_v39 }
 0x76b   : > { %v2117_v32 = vmul.f32 %v2116_v17, %v2091_v21 }
 0x76d   : > { %2773 = vmatmul.mubr.f32.vlgmr.msra.gmra.mrb[2].mxu0 %v2117_v32 }
 0x76e   : > { %2783 = vmatprep.mubr.msk.f32.mxu0 (!%p2617_p1), %vm3097_vm0, %v3098_v52 }
 0x83f   : > { %2216 = sbr.rel (%p2617_p1) target bundleno = 2645 (0xa55), region = 112 }
 0x840   : > { %v2207_v33 = vpop.f32.mrb[2].mxu0 }
 0x841   : > { %v2208_v44 = vadd.f32 %v2616_v57, %v2207_v33  ;;  %v2774_v34 = vpop.f32.mrb[3].mxu0 }
 0x843   : > { %v2211_v36 = vadd.f32 %v2208_v44, %v3671_v16  ;;  %v2248_v16 = vld [vmem:[%s3901_s1 + $0x8] sm:$0xff] (!%p2617_p1) }
 0x844   : > { %v2847_v5 = vpack.c.bf16 (!%p2617_p1), %v2248_v16, %v2247_v48 }
 0x845   : > { %2212 = vst.msk [vmem:[#allocation2] sm:$0xff] %vm953_vm1, %v2211_v36  ;;  %v2220_v59 = vsel (!%p2617_p1), %vm2219_vm15, %v2211_v36, 0.0 }
 0x846   : > { %2221 = vadd.xlane.f32.xlu0 %v2220_v59  ;;  %2848 = vmatpush3.bf16.msra.mxu0 %v2847_v5 }
 0x847   : > { %2849 = vmatprep.subr.bf16.mxu0 %v3096_v49 }
 0x84a   : > { %2851 = vmatpush3.bf16.msra.mxu0 %v2850_v54 }
 0x8d3   : > { %v2222_v37 = vpop.xlane.xlu0 %2221 }
 0x8d4   : > { %v2223_v38 = vmul.f32 0.03125, %v2222_v37 }
 0x8d6   : > { %v2224_v26 = vsub.f32 %v2211_v36, %v2223_v38 }
 0x8d8   : > { %v2225_v45 = vmul.f32 %v2224_v26, %v2224_v26 }
 0x8da   : > { %v2226_v46 = vsel %vm2219_vm15, %v2225_v45, 0.0 }
 0x8db   : > { %2227 = vadd.xlane.f32.xlu0 %v2226_v46 }
 0x968   : > { %v2228_v4 = vpop.xlane.xlu0 %2227 }
 0x969   : > { %v2229_v62 = vmul.f32 0.03125, %v2228_v4 }
 0x96b   : > { %v2230_v42 = vadd.f32 1e-05, %v2229_v62 }
 0x96d   : > { %2990 = vrsqrt.f32 %v2230_v42 }
 0x977   : > { %v2991_v55 = vpop.eup %2990 }
 0x978   : > { %v2232_v23 = vmul.f32 %v2991_v55, %v2224_v26 }
 0x97a   : > { %v2239_v60 = vmul.f32 %v2618_v24, %v2232_v23 }
 0x97c   : > { %v2246_v40 = vadd.f32 %v2619_v56, %v2239_v60 }
 0x97e   : > { %v2252_v43 = vrot.slane %v2246_v40, 7 }
 0x980   : > { %2784 = vmatmul.mubr.msk.f32.vlgmr.msra.gmra.mrb[0].mxu0 %vm953_vm1, %v2252_v43 }
 0xa53   : > { %v2321_v61 = vpop.f32.mrb[0].mxu0 }
 0xa54   : > { %2326 = vst.msk [vmem:[%s3373_s7] sm:$0x1] %vm2325_vm2, %v2321_v61  ;;  %v2785_v41 = vpop.f32.mrb[1].mxu0 }
 0xa55 PF: > { %s3904_s6 = sld [smem:[#allocation10_spill]]  ;;  %s3906_s17 = sld [smem:[#allocation36_spill]] }
 0xa56   : > { %s2340_s2 = sshll.u32 %s3373_s7, 4  ;;  %s3907_s24 = sand.u32 1, %s3062_s25   ;;  %s2341_s2 = int_to_ptr.vmem [resolvable:$true] %s2340_s2 }
 0xa57   : > { %s2328_s27 = scalar_lea.sflag [#allocation5], %s3907_s24  ;;  %s2992_s29 = scalar_lea.vmem %s2341_s2, 16 }
 0xa58   : > { %p2993_p2 = scmp.ne.s32.totalorder %s2341_s2, %s2992_s29  ;;  %s3099_s18 = smov [#allocation4]  }
 0xa59   : > { %s2996_s9 = sshll.u32 %s3099_s18, 4  ;;  %s2997_s9 = int_to_ptr.vmem [resolvable:$false] %s2996_s9 }
 0xa5a   : > { %p2994_p4 = pnand %p2993_p2, %p3259_p3  ;;  %s2998_s30 = scalar_lea.vmem %s2997_s9, 32 }
 0xa5b   : > { %s2621_s20 = sshll.u32 %s3904_s6, 4  ;;  %p2999_p6 = scmp.lt.s32.totalorder %s2341_s2, %s2997_s9 }
 0xa5c   : > { %s3753_s19 = scalar_lea.hbm %s3906_s17, %s2621_s20  ;;  %p2995_p5 = pneg %p2994_p4 }
 0xa5d   : > { %p3000_p7 = scmp.lt.s32.totalorder %s2998_s30, %s2992_s29 }
 0xa5f   : > { %p3001_p8 = por %p3000_p7, %p2999_p6 }
 0xa61   : > { %p3002_p10 = pnand %p3001_p8, %p2995_p5 }
 0xa63   : > { %3005 = shalt.err (!%p3002_p10)
}
 0xa64   : > { %s3006_s7 = scalar_lea.hbm %s3753_s19, 16  ;;  %s3010_s28 = scalar_lea.hbm %s3906_s17, 32 }
 0xa65   : > { %p3007_p11 = scmp.ne.s32.totalorder %s3753_s19, %s3006_s7  ;;  %p3011_p0 = scmp.lt.u32.totalorder %s3753_s19, %s3906_s17 }
 0xa66   : > { %p3012_p1 = scmp.lt.u32.totalorder %s3010_s28, %s3006_s7  ;;  %p3014_p4 = scmp.lt.u32.totalorder %s3006_s7, %s3753_s19 }
 0xa67   : > { %p3008_p12 = pnand %p3007_p11, %p3259_p3 }
 0xa68   : > { %p3013_p2 = por %p3012_p1, %p3011_p0 }
 0xa69   : > { %p3009_p13 = pneg %p3008_p12 }
 0xa6a   : > { %p3015_p5 = por %p3014_p4, %p3013_p2 }
 0xa6c   : > { %p3016_p6 = pnand %p3015_p5, %p3009_p13 }
 0xa6e   : > { %3019 = shalt.err (!%p3016_p6)
}
 0xa6f   : > { %2852 = dma.vmem_to_hbm [thread:$0]  (%p3259_p3), %s2341_s2, 16, %s3753_s19, %s2328_s27  }
 0xa70 PF: > { %s3908_s16 = sld [smem:[#allocation13_spill]]  ;;  %s3909_s21 = sld [smem:[#allocation7_spill]] }
 0xa76   : > { %p2858_p7 = scmp.ge.s32.totalorder %s3908_s16, 2  ;;  %s2352_s6 = sand.u32 1, %s3909_s21  }
 0xa77   : > { %s2353_s20 = scalar_lea.sflag [#allocation5], %s2352_s6 }
 0xa78   : > { %p2855_p8 = pnand %p2858_p7, %p3269_p9 }
 0xa7a   : > { %3053 = dma.done.wait (!%p2855_p8), %s2353_s20, 16  }
 0xa7b   : > { %3055 = vsyncadd (!%p2855_p8), %s2353_s20, 4294967280  ;;  %s34_s0 = sadd.s32 1, %s3908_s16   ;;  %s3911_s11 = sld [smem:[#allocation8_spill]] }
 0xa7c   : > { %p31_p10 = scmp.ge.s32.totalorder %s34_s0, 6   ;;  %s3912_s26 = sld [smem:[#allocation18_spill]] }
 0xa7d   : > { %s3913_s27 = sld [smem:[#allocation11_spill]]  ;;  %s3914_s3 = sld [smem:[#allocation12_spill]] }
 0xa7e   : > { %s3915_s28 = sld [smem:[#allocation14_spill]]  ;;  %s3916_s29 = sld [smem:[#allocation16_spill]] }
 0xa7f   : > { %s3917_s2 = smov %s3062_s25  ;;  %33 = sbr.rel (!%p31_p10) target bundleno = 22 (0x16), region = 205 }
 0xa81   : > { %s3918_s25 = smov %s3911_s11 }
 0xa86   :  { %2357 = vsyncpa [#allocation5], 1 }
 0xa87   :  { %2359 = vsyncpa [#allocation5 + $0x1], 1 }

</bundles_post_ra>
